<compile_context>
chip_gen: v7x
topology: tpu7x:2x2x1
jax: 0.10.0
libtpu: 0.0.40
codegen_flags: <defaults>
</compile_context>

<pallas_src>
import jax
import jax.numpy as jnp
from jax import lax
from jax.experimental import pallas as pl
from jax.experimental.pallas import tpu as pltpu

EPS = 1e-5  # nn.BatchNorm2d default eps


# --------------------------------------------------------------------------- #
# shared in-kernel helper: zero-padded scratch -> one (H*W, 9*Cin) matmul      #
# --------------------------------------------------------------------------- #
def _im2col_matmul(xpad_ref, w_ref, b_ref, hh, wh, cin):
    """3x3 conv as one MXU matmul: patch (hh*wh, 9*cin) @ w (9*cin, cout)."""
    taps = [xpad_ref[pl.ds(dy, hh), pl.ds(dx, wh), :]
            for dy in range(3) for dx in range(3)]           # 9 x (hh, wh, cin)
    patch = jnp.concatenate(taps, axis=-1).reshape(hh * wh, 9 * cin)
    acc = jnp.dot(patch, w_ref[...], preferred_element_type=jnp.float32)
    return acc + b_ref[...]                                   # bias once, epilogue


# --------------------------------------------------------------------------- #
# kernel 1: maxpool(2) + pad + conv1 + BN partial stats                        #
# --------------------------------------------------------------------------- #
def _pool_conv_stats_kernel(x_ref, w_ref, b_ref,
                            y_ref, sum_ref, sq_ref, xpad_scr):
    # x_ref: (1, H, W, Cin)   w_ref: (9*Cin, Cout)   b_ref: (1, Cout)
    # y_ref: (1, Hh, Wh, Cout)   sum_ref/sq_ref: (1, 1, Cout)
    # xpad_scr: VMEM (Hh+2, Wh+2, Cin)
    hh, wh, cout = y_ref.shape[1], y_ref.shape[2], y_ref.shape[3]
    cin = x_ref.shape[3]

    # 2x2 max pool fused into the conv's input path (no extra HBM round trip).
    p00 = x_ref[:, pl.ds(0, hh, stride=2), pl.ds(0, wh, stride=2), :]
    p01 = x_ref[:, pl.ds(0, hh, stride=2), pl.ds(1, wh, stride=2), :]
    p10 = x_ref[:, pl.ds(1, hh, stride=2), pl.ds(0, wh, stride=2), :]
    p11 = x_ref[:, pl.ds(1, hh, stride=2), pl.ds(1, wh, stride=2), :]
    pooled = jnp.maximum(jnp.maximum(p00, p01), jnp.maximum(p10, p11))

    # conv padding=1 built in VMEM scratch (no jnp.pad materialized in HBM).
    xpad_scr[...] = jnp.zeros_like(xpad_scr)
    xpad_scr[pl.ds(1, hh), pl.ds(1, wh), :] = pooled.reshape(hh, wh, cin)

    acc = _im2col_matmul(xpad_scr, w_ref, b_ref, hh, wh, cin)  # (hh*wh, cout)

    y_ref[...] = acc.reshape(1, hh, wh, cout).astype(y_ref.dtype)
    # Per-image BN partials: batch mean / biased variance are reduced from
    # these in the wrapper without re-reading y from HBM.
    sum_ref[...] = jnp.sum(acc, axis=0).reshape(1, 1, cout)
    sq_ref[...] = jnp.sum(acc * acc, axis=0).reshape(1, 1, cout)


def pool_conv1(x, wflat, b):
    # x: (N, H, W, Cin) NHWC; wflat: (9*Cin, Cout); b: (Cout,)
    n, h, w, cin = x.shape
    hh, wh = h // 2, w // 2
    cout = wflat.shape[-1]
    return pl.pallas_call(
        _pool_conv_stats_kernel,
        out_shape=(jax.ShapeDtypeStruct((n, hh, wh, cout), jnp.float32),
                   jax.ShapeDtypeStruct((n, 1, cout), jnp.float32),
                   jax.ShapeDtypeStruct((n, 1, cout), jnp.float32)),
        grid=(n,),
        in_specs=[
            pl.BlockSpec((1, h, w, cin), lambda i: (i, 0, 0, 0)),
            pl.BlockSpec((9 * cin, cout), lambda i: (0, 0)),
            pl.BlockSpec((1, cout), lambda i: (0, 0)),
        ],
        out_specs=(
            pl.BlockSpec((1, hh, wh, cout), lambda i: (i, 0, 0, 0)),
            pl.BlockSpec((1, 1, cout), lambda i: (i, 0, 0)),
            pl.BlockSpec((1, 1, cout), lambda i: (i, 0, 0)),
        ),
        scratch_shapes=[pltpu.VMEM((hh + 2, wh + 2, cin), jnp.float32)],
        compiler_params=pltpu.CompilerParams(dimension_semantics=("parallel",)),
        cost_estimate=pl.CostEstimate(
            flops=2 * n * hh * wh * 9 * cin * cout,
            transcendentals=0,
            bytes_accessed=4 * (x.size + wflat.size + cout
                                + n * hh * wh * cout + 2 * n * cout)),
    )(x, wflat, b.reshape(1, cout))


# --------------------------------------------------------------------------- #
# kernel 2: BN-apply + ReLU (layer 1) + pad + conv2 + BN partial stats         #
# --------------------------------------------------------------------------- #
def _bnrelu_conv_stats_kernel(z_ref, s_ref, t_ref, w_ref, b_ref,
                              y_ref, sum_ref, sq_ref, zpad_scr):
    # z_ref: (1, Hh, Wh, C1) conv1 pre-activation; s_ref/t_ref: (1, C1)
    # w_ref: (9*C1, C2)   b_ref: (1, C2)   y_ref: (1, Hh, Wh, C2)
    hh, wh, cout = y_ref.shape[1], y_ref.shape[2], y_ref.shape[3]
    cin = z_ref.shape[3]

    # BatchNorm-apply + ReLU of the previous layer, fused into this conv's load.
    s = s_ref[...].reshape(1, 1, 1, cin)
    t = t_ref[...].reshape(1, 1, 1, cin)
    act = jnp.maximum(z_ref[...] * s + t, 0.0)

    zpad_scr[...] = jnp.zeros_like(zpad_scr)
    zpad_scr[pl.ds(1, hh), pl.ds(1, wh), :] = act.reshape(hh, wh, cin)

    acc = _im2col_matmul(zpad_scr, w_ref, b_ref, hh, wh, cin)

    y_ref[...] = acc.reshape(1, hh, wh, cout).astype(y_ref.dtype)
    sum_ref[...] = jnp.sum(acc, axis=0).reshape(1, 1, cout)
    sq_ref[...] = jnp.sum(acc * acc, axis=0).reshape(1, 1, cout)


def bnrelu_conv2(z, scale, shift, wflat, b):
    # z: (N, Hh, Wh, C1) NHWC; scale/shift: (C1,); wflat: (9*C1, C2); b: (C2,)
    n, hh, wh, c1 = z.shape
    c2 = wflat.shape[-1]
    return pl.pallas_call(
        _bnrelu_conv_stats_kernel,
        out_shape=(jax.ShapeDtypeStruct((n, hh, wh, c2), jnp.float32),
                   jax.ShapeDtypeStruct((n, 1, c2), jnp.float32),
                   jax.ShapeDtypeStruct((n, 1, c2), jnp.float32)),
        grid=(n,),
        in_specs=[
            pl.BlockSpec((1, hh, wh, c1), lambda i: (i, 0, 0, 0)),
            pl.BlockSpec((1, c1), lambda i: (0, 0)),
            pl.BlockSpec((1, c1), lambda i: (0, 0)),
            pl.BlockSpec((9 * c1, c2), lambda i: (0, 0)),
            pl.BlockSpec((1, c2), lambda i: (0, 0)),
        ],
        out_specs=(
            pl.BlockSpec((1, hh, wh, c2), lambda i: (i, 0, 0, 0)),
            pl.BlockSpec((1, 1, c2), lambda i: (i, 0, 0)),
            pl.BlockSpec((1, 1, c2), lambda i: (i, 0, 0)),
        ),
        scratch_shapes=[pltpu.VMEM((hh + 2, wh + 2, c1), jnp.float32)],
        compiler_params=pltpu.CompilerParams(dimension_semantics=("parallel",)),
        cost_estimate=pl.CostEstimate(
            flops=2 * n * hh * wh * 9 * c1 * c2,
            transcendentals=0,
            bytes_accessed=4 * (z.size + wflat.size + 2 * c1 + c2
                                + n * hh * wh * c2 + 2 * n * c2)),
    )(z, scale.reshape(1, c1), shift.reshape(1, c1), wflat, b.reshape(1, c2))


# --------------------------------------------------------------------------- #
# kernel 3: final BatchNorm-apply + ReLU (elementwise)                         #
# --------------------------------------------------------------------------- #
def _bn_relu_kernel(x_ref, s_ref, t_ref, o_ref):
    s = s_ref[...].reshape(1, 1, 1, -1)
    t = t_ref[...].reshape(1, 1, 1, -1)
    o_ref[...] = jnp.maximum(x_ref[...] * s + t, 0.0).astype(o_ref.dtype)


def bn_relu(x, scale, shift):  # x: (N, H, W, C)
    n, h, w, c = x.shape
    return pl.pallas_call(
        _bn_relu_kernel,
        out_shape=jax.ShapeDtypeStruct((n, h, w, c), x.dtype),
        grid=(n,),
        in_specs=[
            pl.BlockSpec((1, h, w, c), lambda i: (i, 0, 0, 0)),
            pl.BlockSpec((1, c), lambda i: (0, 0)),
            pl.BlockSpec((1, c), lambda i: (0, 0)),
        ],
        out_specs=pl.BlockSpec((1, h, w, c), lambda i: (i, 0, 0, 0)),
        compiler_params=pltpu.CompilerParams(dimension_semantics=("parallel",)),
    )(x, scale.reshape(1, c), shift.reshape(1, c))


# --------------------------------------------------------------------------- #
# Down forward (NCHW in / NCHW out, PyTorch semantics)                         #
# --------------------------------------------------------------------------- #
def down_forward(x_nchw, params):
    n = x_nchw.shape[0]
    x = jnp.transpose(x_nchw, (0, 2, 3, 1))              # NCHW -> NHWC

    w1, b1, g1, be1 = params["conv1"]
    w2, b2, g2, be2 = params["conv2"]
    c1, c2 = w1.shape[-1], w2.shape[-1]
    w1f = w1.reshape(9 * w1.shape[2], c1)                # (3,3,Cin,C1) -> (9*Cin, C1)
    w2f = w2.reshape(9 * w2.shape[2], c2)

    # layer 1: pool + conv1 + BN partial stats in one kernel
    y1, s1, q1 = pool_conv1(x, w1f, b1)
    cnt = n * y1.shape[1] * y1.shape[2]
    mean1 = jnp.sum(s1, axis=(0, 1)) / cnt
    var1 = jnp.sum(q1, axis=(0, 1)) / cnt - mean1 * mean1   # biased variance
    scale1 = g1 * lax.rsqrt(var1 + EPS)
    shift1 = be1 - mean1 * scale1

    # layer 2: BN-apply+ReLU of layer 1 folded into conv2's kernel
    y2, s2, q2 = bnrelu_conv2(y1, scale1, shift1, w2f, b2)
    mean2 = jnp.sum(s2, axis=(0, 1)) / cnt
    var2 = jnp.sum(q2, axis=(0, 1)) / cnt - mean2 * mean2
    scale2 = g2 * lax.rsqrt(var2 + EPS)
    shift2 = be2 - mean2 * scale2

    out = bn_relu(y2, scale2, shift2)
    return jnp.transpose(out, (0, 3, 1, 2))              # NHWC -> NCHW


# --------------------------------------------------------------------------- #
# pure-JAX reference (NCHW, matches PyTorch training-mode forward)             #
# --------------------------------------------------------------------------- #
def ref_down(x_nchw, params):
    x = lax.reduce_window(x_nchw, -jnp.inf, lax.max,
                          (1, 1, 2, 2), (1, 1, 2, 2), "VALID")
    for layer in ("conv1", "conv2"):
        w, b, gamma, beta = params[layer]
        y = lax.conv_general_dilated(
            x, w, (1, 1), "SAME",
            dimension_numbers=("NCHW", "HWIO", "NCHW"))
        y = y + b.reshape(1, -1, 1, 1)
        mean = jnp.mean(y, axis=(0, 2, 3), keepdims=True)
        var = jnp.var(y, axis=(0, 2, 3), keepdims=True)
        y = (y - mean) * lax.rsqrt(var + EPS) * gamma.reshape(1, -1, 1, 1) \
            + beta.reshape(1, -1, 1, 1)
        x = jnp.maximum(y, 0.0)
    return x


# --------------------------------------------------------------------------- #
# deterministic init                                                           #
# --------------------------------------------------------------------------- #
def init_params(key, cin, cout):
    ks = jax.random.split(key, 8)

    def conv_block(kw, kb, kg, kbe, ci, co):
        w = 0.1 * jax.random.normal(kw, (3, 3, ci, co), jnp.float32)   # HWIO
        b = 0.1 * jax.random.normal(kb, (co,), jnp.float32)
        gamma = 1.0 + 0.1 * jax.random.normal(kg, (co,), jnp.float32)
        beta = 0.1 * jax.random.normal(kbe, (co,), jnp.float32)
        return (w, b, gamma, beta)

    return {
        "conv1": conv_block(ks[0], ks[1], ks[2], ks[3], cin, cout),
        "conv2": conv_block(ks[4], ks[5], ks[6], ks[7], cout, cout),
    }


if __name__ == "__main__":
    key = jax.random.PRNGKey(0)
    kx, kp = jax.random.split(key)
    N, Cin, H, W = 2, 4, 16, 16
    Cout = 8
    x = jax.random.normal(kx, (N, Cin, H, W), jnp.float32)
    params = init_params(kp, Cin, Cout)

    out = jax.block_until_ready(jax.jit(down_forward)(x, params))
    assert out.shape == (N, Cout, H // 2, W // 2), out.shape

    ref = ref_down(x, params)
    err = float(jnp.max(jnp.abs(out - ref)))
    assert err < 1e-4, f"max abs err {err}"
    print("KERNEL_OK")
</pallas_src>

<mosaic_0001>
module attributes {stable_mosaic.version = 11 : i64} {
  func.func @_pool_conv_stats_kernel(%arg0: i32, %arg1: memref<1x16x16x4xf32, #tpu.memory_space<vmem>>, %arg2: memref<36x8xf32, #tpu.memory_space<vmem>>, %arg3: memref<1x8xf32, #tpu.memory_space<vmem>>, %arg4: memref<1x8x8x8xf32, #tpu.memory_space<vmem>>, %arg5: memref<1x1x8xf32, #tpu.memory_space<vmem>>, %arg6: memref<1x1x8xf32, #tpu.memory_space<vmem>>, %arg7: memref<10x10x4xf32, #tpu.memory_space<vmem>>) attributes {dimension_semantics = [#tpu.dimension_semantics<parallel>], iteration_bounds = array<i64: 2>, scalar_prefetch = 0 : i64, scratch_operands = 1 : i64, tpu.core_type = #tpu.core_type<tc>, window_params = [{transform_indices = @transform_0, window_bounds = array<i64: 1, 16, 16, 4>}, {pipeline_mode = #tpu.pipeline_mode<synchronous>, transform_indices = @transform_1, window_bounds = array<i64: 36, 8>}, {pipeline_mode = #tpu.pipeline_mode<synchronous>, transform_indices = @transform_2, window_bounds = array<i64: 1, 8>}, {transform_indices = @transform_3, window_bounds = array<i64: 1, 8, 8, 8>}, {transform_indices = @transform_4, window_bounds = array<i64: 1, 1, 8>}, {transform_indices = @transform_5, window_bounds = array<i64: 1, 1, 8>}]} {
    %c0 = arith.constant 0 : index
    %c0_0 = arith.constant 0 : index
    %c0_1 = arith.constant 0 : index
    %c0_2 = arith.constant 0 : index
    %0 = tpu.strided_load %arg1[%c0, %c0_0, %c0_1, %c0_2] {strides = array<i32: 1, 2, 2, 1>} : memref<1x16x16x4xf32, #tpu.memory_space<vmem>>, vector<1x8x8x4xf32>
    %c0_3 = arith.constant 0 : index
    %c0_4 = arith.constant 0 : index
    %c1 = arith.constant 1 : index
    %c0_5 = arith.constant 0 : index
    %1 = tpu.strided_load %arg1[%c0_3, %c0_4, %c1, %c0_5] {strides = array<i32: 1, 2, 2, 1>} : memref<1x16x16x4xf32, #tpu.memory_space<vmem>>, vector<1x8x8x4xf32>
    %c0_6 = arith.constant 0 : index
    %c1_7 = arith.constant 1 : index
    %c0_8 = arith.constant 0 : index
    %c0_9 = arith.constant 0 : index
    %2 = tpu.strided_load %arg1[%c0_6, %c1_7, %c0_8, %c0_9] {strides = array<i32: 1, 2, 2, 1>} : memref<1x16x16x4xf32, #tpu.memory_space<vmem>>, vector<1x8x8x4xf32>
    %c0_10 = arith.constant 0 : index
    %c1_11 = arith.constant 1 : index
    %c1_12 = arith.constant 1 : index
    %c0_13 = arith.constant 0 : index
    %3 = tpu.strided_load %arg1[%c0_10, %c1_11, %c1_12, %c0_13] {strides = array<i32: 1, 2, 2, 1>} : memref<1x16x16x4xf32, #tpu.memory_space<vmem>>, vector<1x8x8x4xf32>
    %4 = arith.maximumf %0, %1 : vector<1x8x8x4xf32>
    %5 = arith.maximumf %2, %3 : vector<1x8x8x4xf32>
    %6 = arith.maximumf %4, %5 : vector<1x8x8x4xf32>
    %cst = arith.constant 0.000000e+00 : f32
    %7 = vector.broadcast %cst : f32 to vector<10x10x4xf32>
    %c0_14 = arith.constant 0 : index
    %c0_15 = arith.constant 0 : index
    %c0_16 = arith.constant 0 : index
    %8 = vector.load %arg7[%c0_14, %c0_15, %c0_16] : memref<10x10x4xf32, #tpu.memory_space<vmem>>, vector<10x10x4xf32>
    tpu.vector_store %arg7[%c0_14, %c0_15, %c0_16], %7 {strides = array<i32>} : memref<10x10x4xf32, #tpu.memory_space<vmem>>, vector<10x10x4xf32>,
    %9 = vector.shape_cast %6 : vector<1x8x8x4xf32> to vector<8x8x4xf32>
    %c1_17 = arith.constant 1 : index
    %c1_18 = arith.constant 1 : index
    %c0_19 = arith.constant 0 : index
    %10 = vector.load %arg7[%c1_17, %c1_18, %c0_19] : memref<10x10x4xf32, #tpu.memory_space<vmem>>, vector<8x8x4xf32>
    tpu.vector_store %arg7[%c1_17, %c1_18, %c0_19], %9 {strides = array<i32>} : memref<10x10x4xf32, #tpu.memory_space<vmem>>, vector<8x8x4xf32>,
    %c0_20 = arith.constant 0 : index
    %c0_21 = arith.constant 0 : index
    %c0_22 = arith.constant 0 : index
    %11 = vector.load %arg7[%c0_20, %c0_21, %c0_22] : memref<10x10x4xf32, #tpu.memory_space<vmem>>, vector<8x8x4xf32>
    %c0_23 = arith.constant 0 : index
    %c1_24 = arith.constant 1 : index
    %c0_25 = arith.constant 0 : index
    %12 = vector.load %arg7[%c0_23, %c1_24, %c0_25] : memref<10x10x4xf32, #tpu.memory_space<vmem>>, vector<8x8x4xf32>
    %c0_26 = arith.constant 0 : index
    %c2 = arith.constant 2 : index
    %c0_27 = arith.constant 0 : index
    %13 = vector.load %arg7[%c0_26, %c2, %c0_27] : memref<10x10x4xf32, #tpu.memory_space<vmem>>, vector<8x8x4xf32>
    %c1_28 = arith.constant 1 : index
    %c0_29 = arith.constant 0 : index
    %c0_30 = arith.constant 0 : index
    %14 = vector.load %arg7[%c1_28, %c0_29, %c0_30] : memref<10x10x4xf32, #tpu.memory_space<vmem>>, vector<8x8x4xf32>
    %c1_31 = arith.constant 1 : index
    %c1_32 = arith.constant 1 : index
    %c0_33 = arith.constant 0 : index
    %15 = vector.load %arg7[%c1_31, %c1_32, %c0_33] : memref<10x10x4xf32, #tpu.memory_space<vmem>>, vector<8x8x4xf32>
    %c1_34 = arith.constant 1 : index
    %c2_35 = arith.constant 2 : index
    %c0_36 = arith.constant 0 : index
    %16 = vector.load %arg7[%c1_34, %c2_35, %c0_36] : memref<10x10x4xf32, #tpu.memory_space<vmem>>, vector<8x8x4xf32>
    %c2_37 = arith.constant 2 : index
    %c0_38 = arith.constant 0 : index
    %c0_39 = arith.constant 0 : index
    %17 = vector.load %arg7[%c2_37, %c0_38, %c0_39] : memref<10x10x4xf32, #tpu.memory_space<vmem>>, vector<8x8x4xf32>
    %c2_40 = arith.constant 2 : index
    %c1_41 = arith.constant 1 : index
    %c0_42 = arith.constant 0 : index
    %18 = vector.load %arg7[%c2_40, %c1_41, %c0_42] : memref<10x10x4xf32, #tpu.memory_space<vmem>>, vector<8x8x4xf32>
    %c2_43 = arith.constant 2 : index
    %c2_44 = arith.constant 2 : index
    %c0_45 = arith.constant 0 : index
    %19 = vector.load %arg7[%c2_43, %c2_44, %c0_45] : memref<10x10x4xf32, #tpu.memory_space<vmem>>, vector<8x8x4xf32>
    %20 = tpu.concatenate %11, %12, %13, %14, %15, %16, %17, %18, %19 in 2 : vector<8x8x4xf32>, vector<8x8x4xf32>, vector<8x8x4xf32>, vector<8x8x4xf32>, vector<8x8x4xf32>, vector<8x8x4xf32>, vector<8x8x4xf32>, vector<8x8x4xf32>, vector<8x8x4xf32> -> vector<8x8x36xf32>
    %21 = vector.shape_cast %20 : vector<8x8x36xf32> to vector<64x36xf32>
    %c0_46 = arith.constant 0 : index
    %c0_47 = arith.constant 0 : index
    %22 = vector.load %arg2[%c0_46, %c0_47] : memref<36x8xf32, #tpu.memory_space<vmem>>, vector<36x8xf32>
    %cst_48 = arith.constant dense<0.000000e+00> : vector<64x8xf32>
    %23 = tpu.matmul %21, %22, %cst_48 {dimension_numbers = #tpu.dot_dimension_numbers<[1], [0], [0], [1], [0, 0, 1, 1], [], []>} : vector<64x36xf32>, vector<36x8xf32>, vector<64x8xf32> -> vector<64x8xf32>
    %c0_49 = arith.constant 0 : index
    %c0_50 = arith.constant 0 : index
    %24 = vector.load %arg3[%c0_49, %c0_50] : memref<1x8xf32, #tpu.memory_space<vmem>>, vector<1x8xf32>
    %25 = vector.broadcast %24 : vector<1x8xf32> to vector<64x8xf32>
    %26 = arith.addf %23, %25 : vector<64x8xf32>
    %27 = vector.shape_cast %26 : vector<64x8xf32> to vector<1x8x8x8xf32>
    %c0_51 = arith.constant 0 : index
    %c0_52 = arith.constant 0 : index
    %c0_53 = arith.constant 0 : index
    %c0_54 = arith.constant 0 : index
    %28 = vector.load %arg4[%c0_51, %c0_52, %c0_53, %c0_54] : memref<1x8x8x8xf32, #tpu.memory_space<vmem>>, vector<1x8x8x8xf32>
    tpu.vector_store %arg4[%c0_51, %c0_52, %c0_53, %c0_54], %27 {strides = array<i32>} : memref<1x8x8x8xf32, #tpu.memory_space<vmem>>, vector<1x8x8x8xf32>,
    %cst_55 = arith.constant dense<0.000000e+00> : vector<8xf32>
    %29 = vector.multi_reduction <add>, %26, %cst_55 [0] : vector<64x8xf32> to vector<8xf32>
    %30 = vector.shape_cast %29 : vector<8xf32> to vector<1x1x8xf32>
    %c0_56 = arith.constant 0 : index
    %c0_57 = arith.constant 0 : index
    %c0_58 = arith.constant 0 : index
    %31 = vector.load %arg5[%c0_56, %c0_57, %c0_58] : memref<1x1x8xf32, #tpu.memory_space<vmem>>, vector<1x1x8xf32>
    tpu.vector_store %arg5[%c0_56, %c0_57, %c0_58], %30 {strides = array<i32>} : memref<1x1x8xf32, #tpu.memory_space<vmem>>, vector<1x1x8xf32>,
    %32 = arith.mulf %26, %26 : vector<64x8xf32>
    %cst_59 = arith.constant dense<0.000000e+00> : vector<8xf32>
    %33 = vector.multi_reduction <add>, %32, %cst_59 [0] : vector<64x8xf32> to vector<8xf32>
    %34 = vector.shape_cast %33 : vector<8xf32> to vector<1x1x8xf32>
    %c0_60 = arith.constant 0 : index
    %c0_61 = arith.constant 0 : index
    %c0_62 = arith.constant 0 : index
    %35 = vector.load %arg6[%c0_60, %c0_61, %c0_62] : memref<1x1x8xf32, #tpu.memory_space<vmem>>, vector<1x1x8xf32>
    tpu.vector_store %arg6[%c0_60, %c0_61, %c0_62], %34 {strides = array<i32>} : memref<1x1x8xf32, #tpu.memory_space<vmem>>, vector<1x1x8xf32>,
    return
  }
  func.func @transform_0(%arg0: i32) -> (i32, i32, i32, i32) {
    %c0_i32 = arith.constant 0 : i32
    %c0_i32_0 = arith.constant 0 : i32
    %c0_i32_1 = arith.constant 0 : i32
    %c0_i32_2 = arith.constant 0 : i32
    return %arg0, %c0_i32, %c0_i32_0, %c0_i32_1 : i32, i32, i32, i32
  }
  func.func @transform_1(%arg0: i32) -> (i32, i32) {
    %c0_i32 = arith.constant 0 : i32
    %c0_i32_0 = arith.constant 0 : i32
    %c0_i32_1 = arith.constant 0 : i32
    return %c0_i32, %c0_i32_0 : i32, i32
  }
  func.func @transform_2(%arg0: i32) -> (i32, i32) {
    %c0_i32 = arith.constant 0 : i32
    %c0_i32_0 = arith.constant 0 : i32
    %c0_i32_1 = arith.constant 0 : i32
    return %c0_i32, %c0_i32_0 : i32, i32
  }
  func.func @transform_3(%arg0: i32) -> (i32, i32, i32, i32) {
    %c0_i32 = arith.constant 0 : i32
    %c0_i32_0 = arith.constant 0 : i32
    %c0_i32_1 = arith.constant 0 : i32
    %c0_i32_2 = arith.constant 0 : i32
    return %arg0, %c0_i32, %c0_i32_0, %c0_i32_1 : i32, i32, i32, i32
  }
  func.func @transform_4(%arg0: i32) -> (i32, i32, i32) {
    %c0_i32 = arith.constant 0 : i32
    %c0_i32_0 = arith.constant 0 : i32
    %c0_i32_1 = arith.constant 0 : i32
    return %arg0, %c0_i32, %c0_i32_0 : i32, i32, i32
  }
  func.func @transform_5(%arg0: i32) -> (i32, i32, i32) {
    %c0_i32 = arith.constant 0 : i32
    %c0_i32_0 = arith.constant 0 : i32
    %c0_i32_1 = arith.constant 0 : i32
    return %arg0, %c0_i32, %c0_i32_0 : i32, i32, i32
  }
}

module attributes {stable_mosaic.version = 11 : i64} {
  func.func @_bn_relu_kernel(%arg0: i32, %arg1: memref<1x8x8x8xf32, #tpu.memory_space<vmem>>, %arg2: memref<1x8xf32, #tpu.memory_space<vmem>>, %arg3: memref<1x8xf32, #tpu.memory_space<vmem>>, %arg4: memref<1x8x8x8xf32, #tpu.memory_space<vmem>>) attributes {dimension_semantics = [#tpu.dimension_semantics<parallel>], iteration_bounds = array<i64: 2>, scalar_prefetch = 0 : i64, scratch_operands = 0 : i64, tpu.core_type = #tpu.core_type<tc>, window_params = [{transform_indices = @transform_0, window_bounds = array<i64: 1, 8, 8, 8>}, {pipeline_mode = #tpu.pipeline_mode<synchronous>, transform_indices = @transform_1, window_bounds = array<i64: 1, 8>}, {pipeline_mode = #tpu.pipeline_mode<synchronous>, transform_indices = @transform_2, window_bounds = array<i64: 1, 8>}, {transform_indices = @transform_3, window_bounds = array<i64: 1, 8, 8, 8>}]} {
    %c0 = arith.constant 0 : index
    %c0_0 = arith.constant 0 : index
    %0 = vector.load %arg2[%c0, %c0_0] : memref<1x8xf32, #tpu.memory_space<vmem>>, vector<1x8xf32>
    %1 = vector.shape_cast %0 : vector<1x8xf32> to vector<1x1x1x8xf32>
    %c0_1 = arith.constant 0 : index
    %c0_2 = arith.constant 0 : index
    %2 = vector.load %arg3[%c0_1, %c0_2] : memref<1x8xf32, #tpu.memory_space<vmem>>, vector<1x8xf32>
    %3 = vector.shape_cast %2 : vector<1x8xf32> to vector<1x1x1x8xf32>
    %c0_3 = arith.constant 0 : index
    %c0_4 = arith.constant 0 : index
    %c0_5 = arith.constant 0 : index
    %c0_6 = arith.constant 0 : index
    %4 = vector.load %arg1[%c0_3, %c0_4, %c0_5, %c0_6] : memref<1x8x8x8xf32, #tpu.memory_space<vmem>>, vector<1x8x8x8xf32>
    %5 = vector.broadcast %1 : vector<1x1x1x8xf32> to vector<1x8x8x8xf32>
    %6 = arith.mulf %4, %5 : vector<1x8x8x8xf32>
    %7 = vector.broadcast %3 : vector<1x1x1x8xf32> to vector<1x8x8x8xf32>
    %8 = arith.addf %6, %7 : vector<1x8x8x8xf32>
    %cst = arith.constant 0.000000e+00 : f32
    %9 = vector.broadcast %cst : f32 to vector<1x8x8x8xf32>
    %10 = arith.maximumf %8, %9 : vector<1x8x8x8xf32>
    %c0_7 = arith.constant 0 : index
    %c0_8 = arith.constant 0 : index
    %c0_9 = arith.constant 0 : index
    %c0_10 = arith.constant 0 : index
    %11 = vector.load %arg4[%c0_7, %c0_8, %c0_9, %c0_10] : memref<1x8x8x8xf32, #tpu.memory_space<vmem>>, vector<1x8x8x8xf32>
    tpu.vector_store %arg4[%c0_7, %c0_8, %c0_9, %c0_10], %10 {strides = array<i32>} : memref<1x8x8x8xf32, #tpu.memory_space<vmem>>, vector<1x8x8x8xf32>,
    return
  }
  func.func @transform_0(%arg0: i32) -> (i32, i32, i32, i32) {
    %c0_i32 = arith.constant 0 : i32
    %c0_i32_0 = arith.constant 0 : i32
    %c0_i32_1 = arith.constant 0 : i32
    %c0_i32_2 = arith.constant 0 : i32
    return %arg0, %c0_i32, %c0_i32_0, %c0_i32_1 : i32, i32, i32, i32
  }
  func.func @transform_1(%arg0: i32) -> (i32, i32) {
    %c0_i32 = arith.constant 0 : i32
    %c0_i32_0 = arith.constant 0 : i32
    %c0_i32_1 = arith.constant 0 : i32
    return %c0_i32, %c0_i32_0 : i32, i32
  }
  func.func @transform_2(%arg0: i32) -> (i32, i32) {
    %c0_i32 = arith.constant 0 : i32
    %c0_i32_0 = arith.constant 0 : i32
    %c0_i32_1 = arith.constant 0 : i32
    return %c0_i32, %c0_i32_0 : i32, i32
  }
  func.func @transform_3(%arg0: i32) -> (i32, i32, i32, i32) {
    %c0_i32 = arith.constant 0 : i32
    %c0_i32_0 = arith.constant 0 : i32
    %c0_i32_1 = arith.constant 0 : i32
    %c0_i32_2 = arith.constant 0 : i32
    return %arg0, %c0_i32, %c0_i32_0, %c0_i32_1 : i32, i32, i32, i32
  }
}

module attributes {stable_mosaic.version = 11 : i64} {
  func.func @_bnrelu_conv_stats_kernel(%arg0: i32, %arg1: memref<1x8x8x8xf32, #tpu.memory_space<vmem>>, %arg2: memref<1x8xf32, #tpu.memory_space<vmem>>, %arg3: memref<1x8xf32, #tpu.memory_space<vmem>>, %arg4: memref<72x8xf32, #tpu.memory_space<vmem>>, %arg5: memref<1x8xf32, #tpu.memory_space<vmem>>, %arg6: memref<1x8x8x8xf32, #tpu.memory_space<vmem>>, %arg7: memref<1x1x8xf32, #tpu.memory_space<vmem>>, %arg8: memref<1x1x8xf32, #tpu.memory_space<vmem>>, %arg9: memref<10x10x8xf32, #tpu.memory_space<vmem>>) attributes {dimension_semantics = [#tpu.dimension_semantics<parallel>], iteration_bounds = array<i64: 2>, scalar_prefetch = 0 : i64, scratch_operands = 1 : i64, tpu.core_type = #tpu.core_type<tc>, window_params = [{transform_indices = @transform_0, window_bounds = array<i64: 1, 8, 8, 8>}, {pipeline_mode = #tpu.pipeline_mode<synchronous>, transform_indices = @transform_1, window_bounds = array<i64: 1, 8>}, {pipeline_mode = #tpu.pipeline_mode<synchronous>, transform_indices = @transform_2, window_bounds = array<i64: 1, 8>}, {pipeline_mode = #tpu.pipeline_mode<synchronous>, transform_indices = @transform_3, window_bounds = array<i64: 72, 8>}, {pipeline_mode = #tpu.pipeline_mode<synchronous>, transform_indices = @transform_4, window_bounds = array<i64: 1, 8>}, {transform_indices = @transform_5, window_bounds = array<i64: 1, 8, 8, 8>}, {transform_indices = @transform_6, window_bounds = array<i64: 1, 1, 8>}, {transform_indices = @transform_7, window_bounds = array<i64: 1, 1, 8>}]} {
    %c0 = arith.constant 0 : index
    %c0_0 = arith.constant 0 : index
    %0 = vector.load %arg2[%c0, %c0_0] : memref<1x8xf32, #tpu.memory_space<vmem>>, vector<1x8xf32>
    %1 = vector.shape_cast %0 : vector<1x8xf32> to vector<1x1x1x8xf32>
    %c0_1 = arith.constant 0 : index
    %c0_2 = arith.constant 0 : index
    %2 = vector.load %arg3[%c0_1, %c0_2] : memref<1x8xf32, #tpu.memory_space<vmem>>, vector<1x8xf32>
    %3 = vector.shape_cast %2 : vector<1x8xf32> to vector<1x1x1x8xf32>
    %c0_3 = arith.constant 0 : index
    %c0_4 = arith.constant 0 : index
    %c0_5 = arith.constant 0 : index
    %c0_6 = arith.constant 0 : index
    %4 = vector.load %arg1[%c0_3, %c0_4, %c0_5, %c0_6] : memref<1x8x8x8xf32, #tpu.memory_space<vmem>>, vector<1x8x8x8xf32>
    %5 = vector.broadcast %1 : vector<1x1x1x8xf32> to vector<1x8x8x8xf32>
    %6 = arith.mulf %4, %5 : vector<1x8x8x8xf32>
    %7 = vector.broadcast %3 : vector<1x1x1x8xf32> to vector<1x8x8x8xf32>
    %8 = arith.addf %6, %7 : vector<1x8x8x8xf32>
    %cst = arith.constant 0.000000e+00 : f32
    %9 = vector.broadcast %cst : f32 to vector<1x8x8x8xf32>
    %10 = arith.maximumf %8, %9 : vector<1x8x8x8xf32>
    %cst_7 = arith.constant 0.000000e+00 : f32
    %11 = vector.broadcast %cst_7 : f32 to vector<10x10x8xf32>
    %c0_8 = arith.constant 0 : index
    %c0_9 = arith.constant 0 : index
    %c0_10 = arith.constant 0 : index
    %12 = vector.load %arg9[%c0_8, %c0_9, %c0_10] : memref<10x10x8xf32, #tpu.memory_space<vmem>>, vector<10x10x8xf32>
    tpu.vector_store %arg9[%c0_8, %c0_9, %c0_10], %11 {strides = array<i32>} : memref<10x10x8xf32, #tpu.memory_space<vmem>>, vector<10x10x8xf32>,
    %13 = vector.shape_cast %10 : vector<1x8x8x8xf32> to vector<8x8x8xf32>
    %c1 = arith.constant 1 : index
    %c1_11 = arith.constant 1 : index
    %c0_12 = arith.constant 0 : index
    %14 = vector.load %arg9[%c1, %c1_11, %c0_12] : memref<10x10x8xf32, #tpu.memory_space<vmem>>, vector<8x8x8xf32>
    tpu.vector_store %arg9[%c1, %c1_11, %c0_12], %13 {strides = array<i32>} : memref<10x10x8xf32, #tpu.memory_space<vmem>>, vector<8x8x8xf32>,
    %c0_13 = arith.constant 0 : index
    %c0_14 = arith.constant 0 : index
    %c0_15 = arith.constant 0 : index
    %15 = vector.load %arg9[%c0_13, %c0_14, %c0_15] : memref<10x10x8xf32, #tpu.memory_space<vmem>>, vector<8x8x8xf32>
    %c0_16 = arith.constant 0 : index
    %c1_17 = arith.constant 1 : index
    %c0_18 = arith.constant 0 : index
    %16 = vector.load %arg9[%c0_16, %c1_17, %c0_18] : memref<10x10x8xf32, #tpu.memory_space<vmem>>, vector<8x8x8xf32>
    %c0_19 = arith.constant 0 : index
    %c2 = arith.constant 2 : index
    %c0_20 = arith.constant 0 : index
    %17 = vector.load %arg9[%c0_19, %c2, %c0_20] : memref<10x10x8xf32, #tpu.memory_space<vmem>>, vector<8x8x8xf32>
    %c1_21 = arith.constant 1 : index
    %c0_22 = arith.constant 0 : index
    %c0_23 = arith.constant 0 : index
    %18 = vector.load %arg9[%c1_21, %c0_22, %c0_23] : memref<10x10x8xf32, #tpu.memory_space<vmem>>, vector<8x8x8xf32>
    %c1_24 = arith.constant 1 : index
    %c1_25 = arith.constant 1 : index
    %c0_26 = arith.constant 0 : index
    %19 = vector.load %arg9[%c1_24, %c1_25, %c0_26] : memref<10x10x8xf32, #tpu.memory_space<vmem>>, vector<8x8x8xf32>
    %c1_27 = arith.constant 1 : index
    %c2_28 = arith.constant 2 : index
    %c0_29 = arith.constant 0 : index
    %20 = vector.load %arg9[%c1_27, %c2_28, %c0_29] : memref<10x10x8xf32, #tpu.memory_space<vmem>>, vector<8x8x8xf32>
    %c2_30 = arith.constant 2 : index
    %c0_31 = arith.constant 0 : index
    %c0_32 = arith.constant 0 : index
    %21 = vector.load %arg9[%c2_30, %c0_31, %c0_32] : memref<10x10x8xf32, #tpu.memory_space<vmem>>, vector<8x8x8xf32>
    %c2_33 = arith.constant 2 : index
    %c1_34 = arith.constant 1 : index
    %c0_35 = arith.constant 0 : index
    %22 = vector.load %arg9[%c2_33, %c1_34, %c0_35] : memref<10x10x8xf32, #tpu.memory_space<vmem>>, vector<8x8x8xf32>
    %c2_36 = arith.constant 2 : index
    %c2_37 = arith.constant 2 : index
    %c0_38 = arith.constant 0 : index
    %23 = vector.load %arg9[%c2_36, %c2_37, %c0_38] : memref<10x10x8xf32, #tpu.memory_space<vmem>>, vector<8x8x8xf32>
    %24 = tpu.concatenate %15, %16, %17, %18, %19, %20, %21, %22, %23 in 2 : vector<8x8x8xf32>, vector<8x8x8xf32>, vector<8x8x8xf32>, vector<8x8x8xf32>, vector<8x8x8xf32>, vector<8x8x8xf32>, vector<8x8x8xf32>, vector<8x8x8xf32>, vector<8x8x8xf32> -> vector<8x8x72xf32>
    %25 = vector.shape_cast %24 : vector<8x8x72xf32> to vector<64x72xf32>
    %c0_39 = arith.constant 0 : index
    %c0_40 = arith.constant 0 : index
    %26 = vector.load %arg4[%c0_39, %c0_40] : memref<72x8xf32, #tpu.memory_space<vmem>>, vector<72x8xf32>
    %cst_41 = arith.constant dense<0.000000e+00> : vector<64x8xf32>
    %27 = tpu.matmul %25, %26, %cst_41 {dimension_numbers = #tpu.dot_dimension_numbers<[1], [0], [0], [1], [0, 0, 1, 1], [], []>} : vector<64x72xf32>, vector<72x8xf32>, vector<64x8xf32> -> vector<64x8xf32>
    %c0_42 = arith.constant 0 : index
    %c0_43 = arith.constant 0 : index
    %28 = vector.load %arg5[%c0_42, %c0_43] : memref<1x8xf32, #tpu.memory_space<vmem>>, vector<1x8xf32>
    %29 = vector.broadcast %28 : vector<1x8xf32> to vector<64x8xf32>
    %30 = arith.addf %27, %29 : vector<64x8xf32>
    %31 = vector.shape_cast %30 : vector<64x8xf32> to vector<1x8x8x8xf32>
    %c0_44 = arith.constant 0 : index
    %c0_45 = arith.constant 0 : index
    %c0_46 = arith.constant 0 : index
    %c0_47 = arith.constant 0 : index
    %32 = vector.load %arg6[%c0_44, %c0_45, %c0_46, %c0_47] : memref<1x8x8x8xf32, #tpu.memory_space<vmem>>, vector<1x8x8x8xf32>
    tpu.vector_store %arg6[%c0_44, %c0_45, %c0_46, %c0_47], %31 {strides = array<i32>} : memref<1x8x8x8xf32, #tpu.memory_space<vmem>>, vector<1x8x8x8xf32>,
    %cst_48 = arith.constant dense<0.000000e+00> : vector<8xf32>
    %33 = vector.multi_reduction <add>, %30, %cst_48 [0] : vector<64x8xf32> to vector<8xf32>
    %34 = vector.shape_cast %33 : vector<8xf32> to vector<1x1x8xf32>
    %c0_49 = arith.constant 0 : index
    %c0_50 = arith.constant 0 : index
    %c0_51 = arith.constant 0 : index
    %35 = vector.load %arg7[%c0_49, %c0_50, %c0_51] : memref<1x1x8xf32, #tpu.memory_space<vmem>>, vector<1x1x8xf32>
    tpu.vector_store %arg7[%c0_49, %c0_50, %c0_51], %34 {strides = array<i32>} : memref<1x1x8xf32, #tpu.memory_space<vmem>>, vector<1x1x8xf32>,
    %36 = arith.mulf %30, %30 : vector<64x8xf32>
    %cst_52 = arith.constant dense<0.000000e+00> : vector<8xf32>
    %37 = vector.multi_reduction <add>, %36, %cst_52 [0] : vector<64x8xf32> to vector<8xf32>
    %38 = vector.shape_cast %37 : vector<8xf32> to vector<1x1x8xf32>
    %c0_53 = arith.constant 0 : index
    %c0_54 = arith.constant 0 : index
    %c0_55 = arith.constant 0 : index
    %39 = vector.load %arg8[%c0_53, %c0_54, %c0_55] : memref<1x1x8xf32, #tpu.memory_space<vmem>>, vector<1x1x8xf32>
    tpu.vector_store %arg8[%c0_53, %c0_54, %c0_55], %38 {strides = array<i32>} : memref<1x1x8xf32, #tpu.memory_space<vmem>>, vector<1x1x8xf32>,
    return
  }
  func.func @transform_0(%arg0: i32) -> (i32, i32, i32, i32) {
    %c0_i32 = arith.constant 0 : i32
    %c0_i32_0 = arith.constant 0 : i32
    %c0_i32_1 = arith.constant 0 : i32
    %c0_i32_2 = arith.constant 0 : i32
    return %arg0, %c0_i32, %c0_i32_0, %c0_i32_1 : i32, i32, i32, i32
  }
  func.func @transform_1(%arg0: i32) -> (i32, i32) {
    %c0_i32 = arith.constant 0 : i32
    %c0_i32_0 = arith.constant 0 : i32
    %c0_i32_1 = arith.constant 0 : i32
    return %c0_i32, %c0_i32_0 : i32, i32
  }
  func.func @transform_2(%arg0: i32) -> (i32, i32) {
    %c0_i32 = arith.constant 0 : i32
    %c0_i32_0 = arith.constant 0 : i32
    %c0_i32_1 = arith.constant 0 : i32
    return %c0_i32, %c0_i32_0 : i32, i32
  }
  func.func @transform_3(%arg0: i32) -> (i32, i32) {
    %c0_i32 = arith.constant 0 : i32
    %c0_i32_0 = arith.constant 0 : i32
    %c0_i32_1 = arith.constant 0 : i32
    return %c0_i32, %c0_i32_0 : i32, i32
  }
  func.func @transform_4(%arg0: i32) -> (i32, i32) {
    %c0_i32 = arith.constant 0 : i32
    %c0_i32_0 = arith.constant 0 : i32
    %c0_i32_1 = arith.constant 0 : i32
    return %c0_i32, %c0_i32_0 : i32, i32
  }
  func.func @transform_5(%arg0: i32) -> (i32, i32, i32, i32) {
    %c0_i32 = arith.constant 0 : i32
    %c0_i32_0 = arith.constant 0 : i32
    %c0_i32_1 = arith.constant 0 : i32
    %c0_i32_2 = arith.constant 0 : i32
    return %arg0, %c0_i32, %c0_i32_0, %c0_i32_1 : i32, i32, i32, i32
  }
  func.func @transform_6(%arg0: i32) -> (i32, i32, i32) {
    %c0_i32 = arith.constant 0 : i32
    %c0_i32_0 = arith.constant 0 : i32
    %c0_i32_1 = arith.constant 0 : i32
    return %arg0, %c0_i32, %c0_i32_0 : i32, i32, i32
  }
  func.func @transform_7(%arg0: i32) -> (i32, i32, i32) {
    %c0_i32 = arith.constant 0 : i32
    %c0_i32_0 = arith.constant 0 : i32
    %c0_i32_1 = arith.constant 0 : i32
    return %arg0, %c0_i32, %c0_i32_0 : i32, i32, i32
  }
}

</mosaic_0001>

<bundles_post_ra>
// kernel: down_forward.5
= control target key start
LH: loop header
LB: loop body
LE: loop exit
PB: predicated region body
PF: predicated region fallthrough
CT: control target
= control target key end

     0   :  { %s332_s12 = smov 0   ;;  %s363_s0 = inlined_call_operand.vmem [shape: f32[2,8,8,8], index: 0, kind: input, shape index: {}]   ;;  %s364_s1 = inlined_call_operand.vmem [shape: f32[1,8], index: 1, kind: input, shape index: {}]   ;;  %s365_s2 = inlined_call_operand.vmem [shape: f32[1,8], index: 2, kind: input, shape index: {}]   ;;  %s366_s3 = inlined_call_operand.vmem [shape: f32[2,8,8,8], index: 3, kind: output, shape index: {}]  }
   0x1 LB: > { %s281_s13 = sadd.s32 4294967295, %s310_s12   ;;  %p285_p0 = scmp.ge.s32.totalorder %s310_s12, 1  ;;  %s310_s12 = sphi %s332_s12, %s13_s12  }
   0x2   : > { %p137_p1 = scmp.lt.s32.totalorder %s310_s12, 3 }
   0x4   : > { %p138_p2 = pnand %p285_p0, %p137_p1 }
   0x5   : > { %p161_p3 = scmp.lt.s32.totalorder (!%p138_p2), %s281_s13, 1  ;;  %v290_v0 = vld [vmem:[%s364_s1] ss:$0 sm:$0xff] (!%p138_p2)  ;;  %vm217_vm0 = vcmask (!%p138_p2), 64512  }
   0x6   : > { %141 = sbr.rel (%p138_p2) target bundleno = 27 (0x1b), region = 32  ;;  %v291_v1 = vld [vmem:[%s365_s2] ss:$0 sm:$0xff] (!%p138_p2) }
   0xd   : > { %s368_s13 = smov (!%p161_p3, %s281_s13), 1 }
   0xe   : > { %s294_s14 = sshll.u32 %s368_s13, 6 }
   0xf   : > { %s165_s19 = scalar_lea.vmem %s363_s0, %s294_s14  ;;  %s170_s24 = scalar_lea.vmem %s366_s3, %s294_s14 }
  0x10   : > { %v173_v2 = vld [vmem:[%s165_s19] sm:$0xff]  ;;  %v174_v3 = vld [vmem:[%s165_s19 + $0x8] sm:$0xff]  ;;  %v175_v4 = vld [vmem:[%s165_s19 + $0x10] sm:$0xff] }
  0x11   : > { %v187_v5 = vmul.f32 %v290_v0, %v173_v2  ;;  %v188_v6 = vmul.f32 %v290_v0, %v174_v3  ;;  %v189_v7 = vmul.f32 %v290_v0, %v175_v4  ;;  %v176_v8 = vld [vmem:[%s165_s19 + $0x18] sm:$0xff]  ;;  %v177_v9 = vld [vmem:[%s165_s19 + $0x20] sm:$0xff]  ;;  %v178_v10 = vld [vmem:[%s165_s19 + $0x28] sm:$0xff] }
  0x12   : > { %v190_v11 = vmul.f32 %v290_v0, %v176_v8  ;;  %v191_v12 = vmul.f32 %v290_v0, %v177_v9  ;;  %v192_v13 = vmul.f32 %v290_v0, %v178_v10  ;;  %v179_v14 = vld [vmem:[%s165_s19 + $0x30] sm:$0xff]  ;;  %v180_v15 = vld [vmem:[%s165_s19 + $0x38] sm:$0xff] }
  0x13   : > { %v201_v16 = vadd.f32 %v291_v1, %v187_v5  ;;  %v202_v17 = vadd.f32 %v291_v1, %v188_v6  ;;  %v203_v18 = vadd.f32 %v291_v1, %v189_v7  ;;  %v193_v19 = vmul.f32 %v290_v0, %v179_v14 }
  0x14   : > { %v204_v20 = vadd.f32 %v291_v1, %v190_v11  ;;  %v205_v21 = vadd.f32 %v291_v1, %v191_v12  ;;  %v206_v22 = vadd.f32 %v291_v1, %v192_v13  ;;  %v194_v23 = vmul.f32 %v290_v0, %v180_v15 }
  0x15   : > { %v209_v24 = vmax.f32 %v201_v16, 0.0  ;;  %v210_v25 = vmax.f32 %v202_v17, 0.0  ;;  %v211_v26 = vmax.f32 %v203_v18, 0.0  ;;  %v207_v27 = vadd.f32 %v291_v1, %v193_v19 }
  0x16   : > { %v212_v28 = vmax.f32 %v204_v20, 0.0  ;;  %v213_v29 = vmax.f32 %v205_v21, 0.0  ;;  %v214_v30 = vmax.f32 %v206_v22, 0.0  ;;  %v208_v31 = vadd.f32 %v291_v1, %v194_v23 }
  0x17   : > { %218 = vst.msk [vmem:[%s170_s24] sm:$0xff] %vm217_vm0, %v209_v24  ;;  %219 = vst.msk [vmem:[%s170_s24 + $0x8] sm:$0xff] %vm217_vm0, %v210_v25  ;;  %v215_v32 = vmax.f32 %v207_v27, 0.0 }
  0x18   : > { %220 = vst.msk [vmem:[%s170_s24 + $0x10] sm:$0xff] %vm217_vm0, %v211_v26  ;;  %221 = vst.msk [vmem:[%s170_s24 + $0x18] sm:$0xff] %vm217_vm0, %v212_v28  ;;  %v216_v33 = vmax.f32 %v208_v31, 0.0 }
  0x19   : > { %222 = vst.msk [vmem:[%s170_s24 + $0x20] sm:$0xff] %vm217_vm0, %v213_v29  ;;  %223 = vst.msk [vmem:[%s170_s24 + $0x28] sm:$0xff] %vm217_vm0, %v214_v30 }
  0x1a   : > { %224 = vst.msk [vmem:[%s170_s24 + $0x30] sm:$0xff] %vm217_vm0, %v215_v32  ;;  %225 = vst.msk [vmem:[%s170_s24 + $0x38] sm:$0xff] %vm217_vm0, %v216_v33 }
  0x1b PF: > { %s13_s12 = sadd.s32 1, %s310_s12  }
  0x1c   : > { %p10_p4 = scmp.ge.s32.totalorder %s13_s12, 4  }
  0x1e   :  { %12 = sbr.rel (!%p10_p4) target bundleno = 1 (0x1), region = 62 }

// kernel: down_forward.3
= control target key start
LH: loop header
LB: loop body
LE: loop exit
PB: predicated region body
PF: predicated region fallthrough
CT: control target
= control target key end

     0   :  { %s1254_s18 = smov 0   ;;  %s1570_s0 = inlined_call_operand.vmem [shape: f32[2,16,16,4], index: 0, kind: input, shape index: {}]   ;;  %s1571_s1 = inlined_call_operand.vmem [shape: f32[36,8], index: 1, kind: input, shape index: {}]   ;;  %s1572_s2 = inlined_call_operand.vmem [shape: f32[1,8], index: 2, kind: input, shape index: {}]   ;;  %s1573_s3 = inlined_call_operand.vmem [shape: f32[2,8,8,8], index: 3, kind: output, shape index: {0}]   ;;  %s1574_s4 = inlined_call_operand.vmem [shape: f32[2,1,8], index: 4, kind: output, shape index: {1}]   ;;  %s1575_s5 = inlined_call_operand.vmem [shape: f32[2,1,8], index: 5, kind: output, shape index: {2}]  }
   0x1 LB: > { %s1087_s19 = sadd.s32 4294967295, %s1213_s18   ;;  %p1091_p0 = scmp.ge.s32.totalorder %s1213_s18, 1  ;;  %s1213_s18 = sphi %s1254_s18, %s16_s18  }
   0x2   : > { %p192_p1 = scmp.lt.s32.totalorder %s1213_s18, 3 }
   0x4   : > { %p193_p2 = pnand %p1091_p0, %p192_p1 }
   0x5   : > { %vm329_vm0 = vcmask (!%p193_p2), 31744   ;;  %vm331_vm1 = vcmask (!%p193_p2), 25600   ;;  %v1215_v0 = vmov (!%p193_p2), 0.0   ;;  %p226_p3 = scmp.lt.s32.totalorder (!%p193_p2), %s1087_s19, 1  ;;  %s1216_s24 = smov (!%p193_p2), 8   ;;  %vm797_vm2 = vcmask (!%p193_p2), 1043456  }
   0x6   : > { %196 = sbr.rel (%p193_p2) target bundleno = 503 (0x1f7), region = 32  ;;  %330 = vst.msk [vmem:[#allocation2] sm:$0xff] (!%p193_p2), %vm329_vm0, %v1215_v0  ;;  %333 = vst.msk [vmem:[#allocation2 + $0x10] sm:$0xff] (!%p193_p2), %vm329_vm0, %v1215_v0  ;;  %s1217_s25 = smov (!%p193_p2), 4   ;;  %vm697_vm3 = vcmask (!%p193_p2), 64512   ;;  %vm706_vm4 = vcmask (!%p193_p2), 97280  }
   0x7   : > { %332 = vst.msk [vmem:[#allocation2 + $0x8] sm:$0x3] (!%p193_p2), %vm331_vm1, %v1215_v0  ;;  %334 = vst.msk [vmem:[#allocation2 + $0x18] sm:$0x3] (!%p193_p2), %vm331_vm1, %v1215_v0  ;;  %s1218_s26 = smov (!%p193_p2), 12   ;;  %s1219_s27 = smov (!%p193_p2), 16  }
   0x8   : > { %335 = vst.msk [vmem:[#allocation2 + $0x20] sm:$0xff] (!%p193_p2), %vm329_vm0, %v1215_v0  ;;  %337 = vst.msk [vmem:[#allocation2 + $0x30] sm:$0xff] (!%p193_p2), %vm329_vm0, %v1215_v0  ;;  %s1220_s28 = smov (!%p193_p2), 20   ;;  %s1221_s8 = smov (!%p193_p2), 24   ;;  %vm715_vm5 = vcmask (!%p193_p2), 130048   ;;  %vm724_vm6 = vcmask (!%p193_p2), 162816  }
   0x9   : > { %336 = vst.msk [vmem:[#allocation2 + $0x28] sm:$0x3] (!%p193_p2), %vm331_vm1, %v1215_v0  ;;  %338 = vst.msk [vmem:[#allocation2 + $0x38] sm:$0x3] (!%p193_p2), %vm331_vm1, %v1215_v0  ;;  %s1222_s15 = smov (!%p193_p2), 28   ;;  %s1223_s16 = smov (!%p193_p2), 32  }
   0xa   : > { %339 = vst.msk [vmem:[#allocation2 + $0x40] sm:$0xff] (!%p193_p2), %vm329_vm0, %v1215_v0  ;;  %341 = vst.msk [vmem:[#allocation2 + $0x50] sm:$0xff] (!%p193_p2), %vm329_vm0, %v1215_v0  ;;  %vm733_vm7 = vcmask (!%p193_p2), 195584   ;;  %vm742_vm8 = vcmask (!%p193_p2), 228352   ;;  %vm751_vm9 = vcmask (!%p193_p2), 261120   ;;  %vm772_vm10 = vcmask (!%p193_p2), 293888  }
   0xb   : > { %340 = vst.msk [vmem:[#allocation2 + $0x48] sm:$0x3] (!%p193_p2), %vm331_vm1, %v1215_v0  ;;  %342 = vst.msk [vmem:[#allocation2 + $0x58] sm:$0x3] (!%p193_p2), %vm331_vm1, %v1215_v0  ;;  %vm935_vm11 = vcmask (!%p193_p2), 57344  }
   0xc   : > { %343 = vst.msk [vmem:[#allocation2 + $0x60] sm:$0xff] (!%p193_p2), %vm329_vm0, %v1215_v0  ;;  %345 = vst.msk [vmem:[#allocation2 + $0x70] sm:$0xff] (!%p193_p2), %vm329_vm0, %v1215_v0 }
   0xd   : > { %344 = vst.msk [vmem:[#allocation2 + $0x68] sm:$0x3] %vm331_vm1, %v1215_v0  ;;  %346 = vst.msk [vmem:[#allocation2 + $0x78] sm:$0x3] %vm331_vm1, %v1215_v0  ;;  %s1577_s19 = smov (!%p226_p3, %s1087_s19), 1 }
   0xe   : > { %347 = vst.msk [vmem:[#allocation2 + $0x80] sm:$0xff] %vm329_vm0, %v1215_v0  ;;  %349 = vst.msk [vmem:[#allocation2 + $0x90] sm:$0xff] %vm329_vm0, %v1215_v0  ;;  %s1139_s20 = sshll.u32 %s1577_s19, 8  ;;  %v376_v4 = vld [vmem:[#allocation2 + $0x2] sm:$0xff]  ;;  %s1140_s17 = sshll.u32 %s1577_s19, 6 }
   0xf   : > { %348 = vst.msk [vmem:[#allocation2 + $0x88] sm:$0x3] %vm331_vm1, %v1215_v0  ;;  %350 = vst.msk [vmem:[#allocation2 + $0x98] sm:$0x3] %vm331_vm1, %v1215_v0  ;;  %s1288_s23 = scalar_lea.vmem %s1570_s0, %s1139_s20  ;;  %v368_v5 = vld [vmem:[#allocation2 + $0x1] sm:$0xff]  ;;  %473 = vrot.lane.b32.xlu1 %v376_v4, %s1216_s24  ;;  %s241_s30 = scalar_lea.vmem %s1575_s5, %s1577_s19 }
  0x10   : > { %v242_v1 = vld [vmem:[%s1288_s23] ss:$2 sm:$0xff]  ;;  %v1103_v2 = vld [vmem:[%s1288_s23 + $0x1] ss:$2 sm:$0xff]  ;;  %v1111_v3 = vld [vmem:[%s1288_s23 + $0x10] ss:$2 sm:$0xff]  ;;  %441 = vrot.lane.b32.xlu0 %v368_v5, %s1217_s25 }
  0x11   : > { %v1119_v6 = vld [vmem:[%s1288_s23 + $0x11] ss:$2 sm:$0xff]  ;;  %v305_v7 = vmax.f32 %v242_v1, %v1103_v2  ;;  %v1096_v9 = vld [vmem:[%s1288_s23 + $0x20] ss:$2 sm:$0xff]  ;;  %v1104_v10 = vld [vmem:[%s1288_s23 + $0x21] ss:$2 sm:$0xff] }
  0x12   : > { %v313_v8 = vmax.f32 %v1111_v3, %v1119_v6  ;;  %v1112_v11 = vld [vmem:[%s1288_s23 + $0x30] ss:$2 sm:$0xff]  ;;  %v1120_v12 = vld [vmem:[%s1288_s23 + $0x31] ss:$2 sm:$0xff]  ;;  %v306_v13 = vmax.f32 %v1096_v9, %v1104_v10  ;;  %v1097_v14 = vld [vmem:[%s1288_s23 + $0x40] ss:$2 sm:$0xff] }
  0x13   : > { %v314_v16 = vmax.f32 %v1112_v11, %v1120_v12  ;;  %v1105_v17 = vld [vmem:[%s1288_s23 + $0x41] ss:$2 sm:$0xff]  ;;  %v1113_v18 = vld [vmem:[%s1288_s23 + $0x50] ss:$2 sm:$0xff]  ;;  %v1121_v19 = vld [vmem:[%s1288_s23 + $0x51] ss:$2 sm:$0xff] }
  0x14   : > { %v321_v15 = vmax.f32 %v305_v7, %v313_v8  ;;  %v307_v20 = vmax.f32 %v1097_v14, %v1105_v17  ;;  %v315_v21 = vmax.f32 %v1113_v18, %v1121_v19  ;;  %v1098_v22 = vld [vmem:[%s1288_s23 + $0x60] ss:$2 sm:$0xff]  ;;  %v1106_v23 = vld [vmem:[%s1288_s23 + $0x61] ss:$2 sm:$0xff]  ;;  %v1114_v24 = vld [vmem:[%s1288_s23 + $0x70] ss:$2 sm:$0xff] }
  0x15   : > { %v322_v25 = vmax.f32 %v306_v13, %v314_v16  ;;  %v1122_v26 = vld [vmem:[%s1288_s23 + $0x71] ss:$2 sm:$0xff]  ;;  %v308_v27 = vmax.f32 %v1098_v22, %v1106_v23  ;;  %v1099_v28 = vld [vmem:[%s1288_s23 + $0x80] ss:$2 sm:$0xff]  ;;  %v1107_v29 = vld [vmem:[%s1288_s23 + $0x81] ss:$2 sm:$0xff] }
  0x16   : > { %352 = vst.msk [vmem:[#allocation2 + $0x11] sm:$0xff] %vm329_vm0, %v321_v15  ;;  %v323_v30 = vmax.f32 %v307_v20, %v315_v21  ;;  %v316_v31 = vmax.f32 %v1114_v24, %v1122_v26  ;;  %v1115_v32 = vld [vmem:[%s1288_s23 + $0x90] ss:$2 sm:$0xff]  ;;  %v1123_v33 = vld [vmem:[%s1288_s23 + $0x91] ss:$2 sm:$0xff]  ;;  %v309_v34 = vmax.f32 %v1099_v28, %v1107_v29  ;;  %v760_v2 = vld [vmem:[%s1571_s1] sm:$0xff] }
  0x17   : > { %v1100_v35 = vld [vmem:[%s1288_s23 + $0xa0] ss:$2 sm:$0xff]  ;;  %353 = vst.msk [vmem:[#allocation2 + $0x21] sm:$0xff] %vm329_vm0, %v322_v25  ;;  %v317_v36 = vmax.f32 %v1115_v32, %v1123_v33  ;;  %v1108_v37 = vld [vmem:[%s1288_s23 + $0xa1] ss:$2 sm:$0xff]  ;;  %v762_v7 = vld [vmem:[%s1571_s1 + $0x10] sm:$0xff] }
  0x18   : > { %v1116_v38 = vld [vmem:[%s1288_s23 + $0xb0] ss:$2 sm:$0xff]  ;;  %v1124_v39 = vld [vmem:[%s1288_s23 + $0xb1] ss:$2 sm:$0xff]  ;;  %354 = vst.msk [vmem:[#allocation2 + $0x31] sm:$0xff] %vm329_vm0, %v323_v30  ;;  %v324_v40 = vmax.f32 %v308_v27, %v316_v31  ;;  %v310_v41 = vmax.f32 %v1100_v35, %v1108_v37  ;;  %v761_v3 = vld [vmem:[%s1571_s1 + $0x8] sm:$0xff] }
  0x19   : > { %v318_v42 = vmax.f32 %v1116_v38, %v1124_v39  ;;  %v1101_v43 = vld [vmem:[%s1288_s23 + $0xc0] ss:$2 sm:$0xff]  ;;  %v1109_v44 = vld [vmem:[%s1288_s23 + $0xc1] ss:$2 sm:$0xff]  ;;  %v1117_v45 = vld [vmem:[%s1288_s23 + $0xd0] ss:$2 sm:$0xff]  ;;  %v325_v46 = vmax.f32 %v309_v34, %v317_v36  ;;  %v1176_v4 = vpack.c.bf16 %v761_v3, %v760_v2 }
  0x1a   : > { %v1125_v47 = vld [vmem:[%s1288_s23 + $0xd1] ss:$2 sm:$0xff]  ;;  %v311_v48 = vmax.f32 %v1101_v43, %v1109_v44  ;;  %v1102_v49 = vld [vmem:[%s1288_s23 + $0xe0] ss:$2 sm:$0xff]  ;;  %v1110_v50 = vld [vmem:[%s1288_s23 + $0xe1] ss:$2 sm:$0xff] }
  0x1b   : > { %355 = vst.msk [vmem:[#allocation2 + $0x41] sm:$0xff] %vm329_vm0, %v324_v40  ;;  %v326_v51 = vmax.f32 %v310_v41, %v318_v42  ;;  %v319_v52 = vmax.f32 %v1117_v45, %v1125_v47  ;;  %v1118_v53 = vld [vmem:[%s1288_s23 + $0xf0] ss:$2 sm:$0xff]  ;;  %v1126_v54 = vld [vmem:[%s1288_s23 + $0xf1] ss:$2 sm:$0xff]  ;;  %v312_v55 = vmax.f32 %v1102_v49, %v1110_v50  ;;  %356 = vst.msk [vmem:[#allocation2 + $0x51] sm:$0xff] %vm329_vm0, %v325_v46  ;;  %1177 = vmatprep.subr.bf16.mxu0 %v1176_v4 }
  0x1c   : > { %v320_v56 = vmax.f32 %v1118_v53, %v1126_v54  ;;  %1184 = vmatprep.subr.bf16.mxu1 %v1176_v4  ;;  %1179 = vmatpush3.bf16.msra.mxu0 %v1176_v4  ;;  %v763_v8 = vld [vmem:[%s1571_s1 + $0x18] sm:$0xff]  ;;  %v764_v10 = vld [vmem:[%s1571_s1 + $0x20] sm:$0xf]  ;;  %v416_v28 = vld [vmem:[#allocation2 + $0x90] sm:$0xff] }
  0x1d   : > { %v377_v57 = vld [vmem:[#allocation2 + $0x12] sm:$0xff]  ;;  %357 = vst.msk [vmem:[#allocation2 + $0x61] sm:$0xff] %vm329_vm0, %v326_v51  ;;  %v327_v59 = vmax.f32 %v311_v48, %v319_v52  ;;  %1187 = vmatpush3.bf16.msra.mxu1 %v1176_v4  ;;  %v1180_v9 = vpack.c.bf16 %v763_v8, %v762_v7  ;;  %v360_v45 = vld [vmem:[#allocation2] sm:$0xff] }
  0x1e   : > { %v369_v58 = vld [vmem:[#allocation2 + $0x11] sm:$0xff]  ;;  %475 = vrot.lane.b32.xlu1 %v377_v57, %s1216_s24  ;;  %v328_v60 = vmax.f32 %v312_v55, %v320_v56  ;;  %v1332_v61 = vld [vmem:[#allocation2 + $0x20] sm:$0xff] }
  0x1f   : > { %443 = vrot.lane.b32.xlu0 %v369_v58, %s1217_s25  ;;  %v1334_v62 = vld [vmem:[#allocation2 + $0x10] sm:$0xff]  ;;  %358 = vst.msk [vmem:[#allocation2 + $0x71] sm:$0xff] %vm329_vm0, %v327_v59  ;;  %v370_v63 = vld [vmem:[#allocation2 + $0x21] sm:$0xff]  ;;  %1181 = vmatprep.subr.bf16.mxu0 %v1180_v9 }
  0x20   : > { %359 = vst.msk [vmem:[#allocation2 + $0x81] sm:$0xff] %vm329_vm0, %v328_v60  ;;  %v378_v0 = vld [vmem:[#allocation2 + $0x22] sm:$0xff]  ;;  %v371_v1 = vld [vmem:[#allocation2 + $0x31] sm:$0xff]  ;;  %1185 = vmatprep.subr.bf16.mxu1 %v1180_v9  ;;  %1183 = vmatpush3.bf16.msra.mxu0 %v1180_v9 }
  0x21   : > { %v1357_v5 = vld [vmem:[#allocation2 + $0x30] sm:$0xff]  ;;  %1188 = vmatpush3.bf16.msra.mxu1 %v1180_v9  ;;  %1162 = vmatprep.subr.msk.mxu0 %vm797_vm2, %v764_v10 }
  0x22   : > { %507 = vrot.lane.b32.xlu1 %v1332_v61, %s1218_s26  ;;  %v379_v6 = vld [vmem:[#allocation2 + $0x32] sm:$0xff]  ;;  %v1374_v11 = vld [vmem:[#allocation2 + $0x40] sm:$0xff]  ;;  %1186 = vmatprep.subr.msk.mxu1 %vm797_vm2, %v764_v10 }
  0x23   : > { %505 = vrot.lane.b32.xlu0 %v1334_v62, %s1218_s26  ;;  %v395_v12 = vld [vmem:[#allocation2 + $0x41] sm:$0xff]  ;;  %v373_v14 = vld [vmem:[#allocation2 + $0x51] sm:$0xff] }
  0x24   : > { %1163 = vmatpush3.msk.msra.mxu0 %vm797_vm2, %v764_v10  ;;  %v380_v13 = vld [vmem:[#allocation2 + $0x42] sm:$0xff]  ;;  %v1390_v15 = vld [vmem:[#allocation2 + $0x50] sm:$0xff] }
  0x25   : > { %1189 = vmatpush3.msk.msra.mxu1 %vm797_vm2, %v764_v10  ;;  %v381_v16 = vld [vmem:[#allocation2 + $0x52] sm:$0xff]  ;;  %v1398_v17 = vld [vmem:[#allocation2 + $0x60] sm:$0xff] }
  0x26   : > { %445 = vrot.lane.b32.xlu1 %v370_v63, %s1217_s25  ;;  %v397_v18 = vld [vmem:[#allocation2 + $0x61] sm:$0xff]  ;;  %v375_v20 = vld [vmem:[#allocation2 + $0x71] sm:$0xff] }
  0x27   : > { %537 = vrot.lane.b32.xlu0 %v369_v58, %s1219_s27  ;;  %v382_v19 = vld [vmem:[#allocation2 + $0x62] sm:$0xff]  ;;  %v1414_v21 = vld [vmem:[#allocation2 + $0x70] sm:$0xff] }
  0x28   : > { %v383_v22 = vld [vmem:[#allocation2 + $0x72] sm:$0xff]  ;;  %v391_v23 = vld [vmem:[#allocation2 + $0x80] sm:$0xff] }
  0x29   : > { %v399_v24 = vld [vmem:[#allocation2 + $0x81] sm:$0xff]  ;;  %v424_v29 = vld [vmem:[#allocation2 + $0x91] sm:$0xff] }
  0x2a   : > { %569 = vrot.lane.b32.xlu1 %v377_v57, %s1220_s28  ;;  %v407_v25 = vld [vmem:[#allocation2 + $0x82] sm:$0xff]  ;;  %v432_v32 = vld [vmem:[#allocation2 + $0x92] sm:$0xff] }
  0x2b   : > { %539 = vrot.lane.b32.xlu0 %v370_v63, %s1219_s27 }
  0x2e   : > { %477 = vrot.lane.b32.xlu1 %v378_v0, %s1216_s24 }
  0x2f   : > { %447 = vrot.lane.b32.xlu0 %v371_v1, %s1217_s25 }
  0x32   : > { %601 = vrot.lane.b32.xlu1 %v1332_v61, %s1221_s8 }
  0x33   : > { %571 = vrot.lane.b32.xlu0 %v378_v0, %s1220_s28 }
  0x36   : > { %509 = vrot.lane.b32.xlu1 %v1357_v5, %s1218_s26 }
  0x37   : > { %479 = vrot.lane.b32.xlu0 %v379_v6, %s1216_s24 }
  0x3a   : > { %633 = vrot.lane.b32.xlu1 %v370_v63, %s1222_s15 }
  0x3b   : > { %603 = vrot.lane.b32.xlu0 %v1357_v5, %s1221_s8 }
  0x3e   : > { %541 = vrot.lane.b32.xlu1 %v371_v1, %s1219_s27 }
  0x3f   : > { %511 = vrot.lane.b32.xlu0 %v1374_v11, %s1218_s26 }
  0x42   : > { %665 = vrot.lane.b32.xlu1 %v378_v0, %s1223_s16 }
  0x43   : > { %635 = vrot.lane.b32.xlu0 %v371_v1, %s1222_s15 }
  0x46   : > { %543 = vrot.lane.b32.xlu1 %v395_v12, %s1219_s27 }
  0x47   : > { %449 = vrot.lane.b32.xlu0 %v395_v12, %s1217_s25 }
  0x4a   : > { %667 = vrot.lane.b32.xlu1 %v379_v6, %s1223_s16 }
  0x4b   : > { %573 = vrot.lane.b32.xlu0 %v379_v6, %s1220_s28 }
  0x4e   : > { %481 = vrot.lane.b32.xlu1 %v380_v13, %s1216_s24 }
  0x4f   : > { %451 = vrot.lane.b32.xlu0 %v373_v14, %s1217_s25 }
  0x52   : > { %605 = vrot.lane.b32.xlu1 %v1374_v11, %s1221_s8 }
  0x53   : > { %575 = vrot.lane.b32.xlu0 %v380_v13, %s1220_s28 }
  0x56   : > { %513 = vrot.lane.b32.xlu1 %v1390_v15, %s1218_s26 }
  0x57   : > { %483 = vrot.lane.b32.xlu0 %v381_v16, %s1216_s24 }
  0x5a   : > { %637 = vrot.lane.b32.xlu1 %v395_v12, %s1222_s15 }
  0x5b   : > { %607 = vrot.lane.b32.xlu0 %v1390_v15, %s1221_s8 }
  0x5e   : > { %545 = vrot.lane.b32.xlu1 %v373_v14, %s1219_s27 }
  0x5f   : > { %515 = vrot.lane.b32.xlu0 %v1398_v17, %s1218_s26 }
  0x62   : > { %669 = vrot.lane.b32.xlu1 %v380_v13, %s1223_s16 }
  0x63   : > { %639 = vrot.lane.b32.xlu0 %v373_v14, %s1222_s15 }
  0x66   : > { %547 = vrot.lane.b32.xlu1 %v397_v18, %s1219_s27 }
  0x67   : > { %453 = vrot.lane.b32.xlu0 %v397_v18, %s1217_s25 }
  0x6a   : > { %671 = vrot.lane.b32.xlu1 %v381_v16, %s1223_s16 }
  0x6b   : > { %577 = vrot.lane.b32.xlu0 %v381_v16, %s1220_s28 }
  0x6e   : > { %485 = vrot.lane.b32.xlu1 %v382_v19, %s1216_s24 }
  0x6f   : > { %455 = vrot.lane.b32.xlu0 %v375_v20, %s1217_s25 }
  0x72   : > { %609 = vrot.lane.b32.xlu1 %v1398_v17, %s1221_s8 }
  0x73   : > { %579 = vrot.lane.b32.xlu0 %v382_v19, %s1220_s28 }
  0x76   : > { %517 = vrot.lane.b32.xlu1 %v1414_v21, %s1218_s26 }
  0x77   : > { %487 = vrot.lane.b32.xlu0 %v383_v22, %s1216_s24  ;;  %s1525_s24 = scalar_lea.vmem %s1573_s3, %s1140_s17 }
  0x7a   : > { %641 = vrot.lane.b32.xlu1 %v397_v18, %s1222_s15 }
  0x7b   : > { %611 = vrot.lane.b32.xlu0 %v1414_v21, %s1221_s8 }
  0x7e   : > { %549 = vrot.lane.b32.xlu1 %v375_v20, %s1219_s27 }
  0x7f   : > { %519 = vrot.lane.b32.xlu0 %v391_v23, %s1218_s26 }
  0x81   : > { %v474_v26 = vpop.permute.xlu1 %473 }
  0x82   : > { %673 = vrot.lane.b32.xlu1 %v382_v19, %s1223_s16  ;;  %v442_v27 = vpop.permute.xlu0 %441 }
  0x83   : > { %643 = vrot.lane.b32.xlu0 %v375_v20, %s1222_s15  ;;  %v689_v46 = vsel %vm329_vm0, %v360_v45, %v442_v27 }
  0x84   : > { %v698_v49 = vsel %vm697_vm3, %v689_v46, %v474_v26 }
  0x86   : > { %581 = vrot.lane.b32.xlu1 %v383_v22, %s1220_s28 }
  0x87   : > { %551 = vrot.lane.b32.xlu0 %v399_v24, %s1219_s27  ;;  %s238_s27 = scalar_lea.vmem %s1574_s4, %s1577_s19 }
  0x8a   : > { %583 = vrot.lane.b32.xlu1 %v407_v25, %s1220_s28 }
  0x8b   : > { %675 = vrot.lane.b32.xlu0 %v383_v22, %s1223_s16 }
  0x8e   : > { %615 = vrot.lane.b32.xlu1 %v416_v28, %s1221_s8 }
  0x8f   : > { %613 = vrot.lane.b32.xlu0 %v391_v23, %s1221_s8 }
  0x90   : > { %v476_v30 = vpop.permute.xlu1 %475 }
  0x91   : > { %v444_v31 = vpop.permute.xlu0 %443 }
  0x92   : > { %647 = vrot.lane.b32.xlu1 %v424_v29, %s1222_s15  ;;  %v690_v56 = vsel %vm329_vm0, %v1334_v62, %v444_v31 }
  0x93   : > { %645 = vrot.lane.b32.xlu0 %v399_v24, %s1222_s15  ;;  %v699_v63 = vsel %vm697_vm3, %v690_v56, %v476_v30 }
  0x94   : > { %v508_v33 = vpop.permute.xlu1 %507 }
  0x95   : > { %v506_v34 = vpop.permute.xlu0 %505  ;;  %v708_v0 = vsel %vm706_vm4, %v699_v63, %v508_v33 }
  0x96   : > { %679 = vrot.lane.b32.xlu1 %v432_v32, %s1223_s16  ;;  %v707_v50 = vsel %vm706_vm4, %v698_v49, %v506_v34 }
  0x97   : > { %677 = vrot.lane.b32.xlu0 %v407_v25, %s1223_s16 }
  0x98   : > { %v446_v35 = vpop.permute.xlu1 %445 }
  0x99   : > { %v538_v36 = vpop.permute.xlu0 %537  ;;  %v691_v22 = vsel %vm329_vm0, %v1332_v61, %v446_v35 }
  0x9a   : > { %v716_v53 = vsel %vm715_vm5, %v707_v50, %v538_v36 }
  0x9c   : > { %v570_v37 = vpop.permute.xlu1 %569 }
  0x9d   : > { %v540_v38 = vpop.permute.xlu0 %539  ;;  %v725_v54 = vsel %vm724_vm6, %v716_v53, %v570_v37 }
  0x9e   : > { %v717_v3 = vsel %vm715_vm5, %v708_v0, %v540_v38 }
  0xa0   : > { %v478_v39 = vpop.permute.xlu1 %477 }
  0xa1   : > { %v1436_v40 = vpop.permute.xlu0 %447  ;;  %v700_v23 = vsel %vm697_vm3, %v691_v22, %v478_v39 }
  0xa2   : > { %v692_v61 = vsel %vm329_vm0, %v1357_v5, %v1436_v40 }
  0xa4   : > { %v602_v41 = vpop.permute.xlu1 %601 }
  0xa5   : > { %v572_v42 = vpop.permute.xlu0 %571  ;;  %v734_v55 = vsel %vm733_vm7, %v725_v54, %v602_v41 }
  0xa6   : > { %v726_v4 = vsel %vm724_vm6, %v717_v3, %v572_v42 }
  0xa8   : > { %v510_v43 = vpop.permute.xlu1 %509 }
  0xa9   : > { %v480_v44 = vpop.permute.xlu0 %479  ;;  %v709_v24 = vsel %vm706_vm4, %v700_v23, %v510_v43 }
  0xaa   : > { %v701_v34 = vsel %vm697_vm3, %v692_v61, %v480_v44 }
  0xac   : > { %v634_v47 = vpop.permute.xlu1 %633 }
  0xad   : > { %v604_v48 = vpop.permute.xlu0 %603  ;;  %v743_v57 = vsel %vm742_vm8, %v734_v55, %v634_v47 }
  0xae   : > { %v735_v62 = vsel %vm733_vm7, %v726_v4, %v604_v48 }
  0xb0   : > { %v542_v51 = vpop.permute.xlu1 %541 }
  0xb1   : > { %v512_v52 = vpop.permute.xlu0 %511  ;;  %v718_v27 = vsel %vm715_vm5, %v709_v24, %v542_v51 }
  0xb2   : > { %v710_v35 = vsel %vm706_vm4, %v701_v34, %v512_v52 }
  0xb4   : > { %v666_v58 = vpop.permute.xlu1 %665 }
  0xb5   : > { %v636_v59 = vpop.permute.xlu0 %635  ;;  %v752_v60 = vsel %vm751_vm9, %v743_v57, %v666_v58 }
  0xb6   : > { %1164 = vmatprep.mubr.msk.f32.mxu0 %vm772_vm10, %v752_v60  ;;  %v744_v6 = vsel %vm742_vm8, %v735_v62, %v636_v59 }
  0xb8   : > { %v544_v1 = vpop.permute.xlu1 %543 }
  0xb9   : > { %v450_v2 = vpop.permute.xlu0 %449  ;;  %v719_v38 = vsel %vm715_vm5, %v710_v35, %v544_v1  ;;  %v1127_v35 = vld [vmem:[%s1572_s2] ss:$0 sm:$0xff] }
  0xba   : > { %v693_v52 = vsel %vm329_vm0, %v1374_v11, %v450_v2 }
  0xbc   : > { %v668_v7 = vpop.permute.xlu1 %667 }
  0xbd   : > { %v574_v8 = vpop.permute.xlu0 %573  ;;  %v753_v9 = vsel %vm751_vm9, %v744_v6, %v668_v7 }
  0xbe   : > { %1165 = vmatmul.mubr.msk.f32.vlgmr.msra.gmra.mrb[0].mxu0 %vm772_vm10, %v753_v9  ;;  %v727_v28 = vsel %vm724_vm6, %v718_v27, %v574_v8 }
  0xc0   : > { %v482_v10 = vpop.permute.xlu1 %481 }
  0xc1   : > { %v452_v12 = vpop.permute.xlu0 %451  ;;  %v702_v53 = vsel %vm697_vm3, %v693_v52, %v482_v10 }
  0xc2   : > { %v694_v11 = vsel %vm329_vm0, %v1390_v15, %v452_v12 }
  0xc4   : > { %v606_v13 = vpop.permute.xlu1 %605 }
  0xc5   : > { %v576_v14 = vpop.permute.xlu0 %575  ;;  %v736_v29 = vsel %vm733_vm7, %v727_v28, %v606_v13 }
  0xc6   : > { %v728_v39 = vsel %vm724_vm6, %v719_v38, %v576_v14 }
  0xc8   : > { %v514_v16 = vpop.permute.xlu1 %513 }
  0xc9   : > { %v484_v18 = vpop.permute.xlu0 %483  ;;  %v711_v54 = vsel %vm706_vm4, %v702_v53, %v514_v16 }
  0xca   : > { %v703_v2 = vsel %vm697_vm3, %v694_v11, %v484_v18 }
  0xcc   : > { %v638_v19 = vpop.permute.xlu1 %637 }
  0xcd   : > { %v608_v20 = vpop.permute.xlu0 %607  ;;  %v745_v30 = vsel %vm742_vm8, %v736_v29, %v638_v19 }
  0xce   : > { %v737_v41 = vsel %vm733_vm7, %v728_v39, %v608_v20 }
  0xd0   : > { %v546_v25 = vpop.permute.xlu1 %545 }
  0xd1   : > { %v516_v26 = vpop.permute.xlu0 %515  ;;  %v720_v57 = vsel %vm715_vm5, %v711_v54, %v546_v25 }
  0xd2   : > { %v712_v3 = vsel %vm706_vm4, %v703_v2, %v516_v26 }
  0xd4   : > { %v670_v31 = vpop.permute.xlu1 %669 }
  0xd5   : > { %v640_v32 = vpop.permute.xlu0 %639  ;;  %v754_v33 = vsel %vm751_vm9, %v745_v30, %v670_v31 }
  0xd6   : > { %1167 = vmatprep.mubr.msk.f32.mxu0 %vm772_vm10, %v754_v33  ;;  %v746_v42 = vsel %vm742_vm8, %v737_v41, %v640_v32 }
  0xd8   : > { %v548_v36 = vpop.permute.xlu1 %547 }
  0xd9   : > { %v454_v37 = vpop.permute.xlu0 %453  ;;  %v721_v6 = vsel %vm715_vm5, %v712_v3, %v548_v36 }
  0xda   : > { %v695_v16 = vsel %vm329_vm0, %v1398_v17, %v454_v37 }
  0xdc   : > { %v672_v43 = vpop.permute.xlu1 %671 }
  0xdd   : > { %v578_v45 = vpop.permute.xlu0 %577  ;;  %v755_v5 = vsel %vm751_vm9, %v746_v42, %v672_v43 }
  0xde   : > { %1168 = vmatmul.mubr.msk.f32.gmra.mrb[2].mxu0 %vm772_vm10, %v755_v5  ;;  %v729_v58 = vsel %vm724_vm6, %v720_v57, %v578_v45 }
  0xe0   : > { %v486_v40 = vpop.permute.xlu1 %485 }
  0xe1   : > { %v456_v44 = vpop.permute.xlu0 %455  ;;  %v704_v19 = vsel %vm697_vm3, %v695_v16, %v486_v40 }
  0xe2   : > { %v696_v18 = vsel %vm329_vm0, %v1414_v21, %v456_v44 }
  0xe4   : > { %v610_v46 = vpop.permute.xlu1 %609 }
  0xe5   : > { %v580_v47 = vpop.permute.xlu0 %579  ;;  %v738_v59 = vsel %vm733_vm7, %v729_v58, %v610_v46 }
  0xe6   : > { %v730_v7 = vsel %vm724_vm6, %v721_v6, %v580_v47 }
  0xe8   : > { %v518_v48 = vpop.permute.xlu1 %517 }
  0xe9   : > { %v488_v49 = vpop.permute.xlu0 %487  ;;  %v713_v22 = vsel %vm706_vm4, %v704_v19, %v518_v48 }
  0xea   : > { %v705_v20 = vsel %vm697_vm3, %v696_v18, %v488_v49 }
  0xec   : > { %v642_v50 = vpop.permute.xlu1 %641 }
  0xed   : > { %v612_v51 = vpop.permute.xlu0 %611  ;;  %v747_v60 = vsel %vm742_vm8, %v738_v59, %v642_v50 }
  0xee   : > { %v739_v8 = vsel %vm733_vm7, %v730_v7, %v612_v51 }
  0xf0   : > { %v550_v55 = vpop.permute.xlu1 %549 }
  0xf1   : > { %v520_v56 = vpop.permute.xlu0 %519  ;;  %v722_v26 = vsel %vm715_vm5, %v713_v22, %v550_v55 }
  0xf2   : > { %v714_v23 = vsel %vm706_vm4, %v705_v20, %v520_v56 }
  0xf4   : > { %v674_v63 = vpop.permute.xlu1 %673 }
  0xf5   : > { %v644_v0 = vpop.permute.xlu0 %643  ;;  %v756_v1 = vsel %vm751_vm9, %v747_v60, %v674_v63 }
  0xf6   : > { %1170 = vmatprep.mubr.msk.f32.mxu1 %vm772_vm10, %v756_v1  ;;  %v748_v9 = vsel %vm742_vm8, %v739_v8, %v644_v0 }
  0xf8   : > { %v582_v4 = vpop.permute.xlu1 %581 }
  0xf9   : > { %v552_v62 = vpop.permute.xlu0 %551  ;;  %v731_v17 = vsel %vm724_vm6, %v722_v26, %v582_v4 }
  0xfa   : > { %v723_v27 = vsel %vm715_vm5, %v714_v23, %v552_v62 }
  0xfc   : > { %v584_v10 = vpop.permute.xlu1 %583 }
  0xfd   : > { %v676_v13 = vpop.permute.xlu0 %675  ;;  %v732_v28 = vsel %vm724_vm6, %v723_v27, %v584_v10 }
  0xfe   : > { %v757_v15 = vsel %vm751_vm9, %v748_v9, %v676_v13 }
  0xff   : > { %1171 = vmatmul.mubr.msk.f32.vlgmr.msra.gmra.mrb[0].mxu1 %vm772_vm10, %v757_v15 }
 0x100   : > { %v616_v12 = vpop.permute.xlu1 %615 }
 0x101   : > { %v614_v14 = vpop.permute.xlu0 %613  ;;  %v741_v21 = vsel %vm733_vm7, %v732_v28, %v616_v12 }
 0x102   : > { %v740_v29 = vsel %vm733_vm7, %v731_v17, %v614_v14 }
 0x104   : > { %v648_v24 = vpop.permute.xlu1 %647 }
 0x105   : > { %v646_v25 = vpop.permute.xlu0 %645  ;;  %v750_v30 = vsel %vm742_vm8, %v741_v21, %v648_v24 }
 0x106   : > { %v749_v31 = vsel %vm742_vm8, %v740_v29, %v646_v25 }
 0x108   : > { %v680_v32 = vpop.permute.xlu1 %679 }
 0x109   : > { %v678_v33 = vpop.permute.xlu0 %677  ;;  %v759_v61 = vsel %vm751_vm9, %v750_v30, %v680_v32 }
 0x10a   : > { %v758_v34 = vsel %vm751_vm9, %v749_v31, %v678_v33 }
 0x10b   : > { %1173 = vmatprep.mubr.msk.f32.mxu1 %vm772_vm10, %v758_v34 }
 0x10c   : > { %1174 = vmatmul.mubr.msk.f32.gmra.mrb[2].mxu1 %vm772_vm10, %v759_v61 }
 0x191   : > { %v1166_v36 = vpop.f32.mrb[0].mxu0 }
 0x192   : > { %v873_v37 = vadd.f32 %v1166_v36, %v1127_v35  ;;  %v867_v38 = vpop.f32.mrb[1].mxu0 }
 0x193   : > { %v868_v39 = vadd.f32 %v1127_v35, %v867_v38 }
 0x194   : > { %907 = vst.msk [vmem:[%s1525_s24 + $0x8] sm:$0xff] %vm697_vm3, %v873_v37  ;;  %v915_v41 = vsel %vm697_vm3, %v873_v37, 0.0  ;;  %v938_v42 = vmul.f32 %v873_v37, %v873_v37 }
 0x195   : > { %906 = vst.msk [vmem:[%s1525_s24] sm:$0xff] %vm697_vm3, %v868_v39  ;;  %v914_v43 = vsel %vm697_vm3, %v868_v39, 0.0  ;;  %v937_v45 = vmul.f32 %v868_v39, %v868_v39 }
 0x196   : > { %v946_v5 = vsel %vm697_vm3, %v938_v42, 0.0  ;;  %v916_v40 = vadd.f32 %v915_v41, %v914_v43 }
 0x197   : > { %v945_v44 = vsel %vm697_vm3, %v937_v45, 0.0 }
 0x198   : > { %v947_v46 = vadd.f32 %v946_v5, %v945_v44 }
 0x1b1   : > { %v1169_v47 = vpop.f32.mrb[2].mxu0 }
 0x1b2   : > { %v883_v48 = vadd.f32 %v1169_v47, %v1127_v35  ;;  %v877_v49 = vpop.f32.mrb[3].mxu0 }
 0x1b3   : > { %v878_v50 = vadd.f32 %v1127_v35, %v877_v49 }
 0x1b4   : > { %909 = vst.msk [vmem:[%s1525_s24 + $0x18] sm:$0xff] %vm697_vm3, %v883_v48  ;;  %v940_v51 = vmul.f32 %v883_v48, %v883_v48  ;;  %v919_v55 = vsel %vm697_vm3, %v883_v48, 0.0 }
 0x1b5   : > { %908 = vst.msk [vmem:[%s1525_s24 + $0x10] sm:$0xff] %vm697_vm3, %v878_v50  ;;  %v917_v52 = vsel %vm697_vm3, %v878_v50, 0.0  ;;  %v939_v53 = vmul.f32 %v878_v50, %v878_v50 }
 0x1b6   : > { %v918_v54 = vadd.f32 %v917_v52, %v916_v40  ;;  %v950_v59 = vsel %vm697_vm3, %v940_v51, 0.0 }
 0x1b7   : > { %v948_v56 = vsel %vm697_vm3, %v939_v53, 0.0 }
 0x1b8   : > { %v949_v57 = vadd.f32 %v948_v56, %v947_v46  ;;  %v920_v58 = vadd.f32 %v919_v55, %v918_v54 }
 0x1ba   : > { %v951_v60 = vadd.f32 %v950_v59, %v949_v57 }
 0x1d2   : > { %v1172_v63 = vpop.f32.mrb[0].mxu1 }
 0x1d3   : > { %v893_v0 = vadd.f32 %v1172_v63, %v1127_v35  ;;  %v887_v1 = vpop.f32.mrb[1].mxu1 }
 0x1d4   : > { %v888_v11 = vadd.f32 %v1127_v35, %v887_v1 }
 0x1d5   : > { %911 = vst.msk [vmem:[%s1525_s24 + $0x28] sm:$0xff] %vm697_vm3, %v893_v0  ;;  %v942_v2 = vmul.f32 %v893_v0, %v893_v0  ;;  %v923_v6 = vsel %vm697_vm3, %v893_v0, 0.0 }
 0x1d6   : > { %910 = vst.msk [vmem:[%s1525_s24 + $0x20] sm:$0xff] %vm697_vm3, %v888_v11  ;;  %v921_v3 = vsel %vm697_vm3, %v888_v11, 0.0  ;;  %v941_v4 = vmul.f32 %v888_v11, %v888_v11 }
 0x1d7   : > { %v922_v62 = vadd.f32 %v921_v3, %v920_v58  ;;  %v954_v10 = vsel %vm697_vm3, %v942_v2, 0.0 }
 0x1d8   : > { %v952_v7 = vsel %vm697_vm3, %v941_v4, 0.0 }
 0x1d9   : > { %v953_v8 = vadd.f32 %v952_v7, %v951_v60  ;;  %v924_v9 = vadd.f32 %v923_v6, %v922_v62 }
 0x1db   : > { %v955_v13 = vadd.f32 %v954_v10, %v953_v8 }
 0x1df   : > { %v1175_v15 = vpop.f32.mrb[2].mxu1 }
 0x1e0   : > { %v903_v12 = vadd.f32 %v1175_v15, %v1127_v35  ;;  %v897_v14 = vpop.f32.mrb[3].mxu1 }
 0x1e1   : > { %v898_v16 = vadd.f32 %v1127_v35, %v897_v14 }
 0x1e2   : > { %913 = vst.msk [vmem:[%s1525_s24 + $0x38] sm:$0xff] %vm697_vm3, %v903_v12  ;;  %v944_v18 = vmul.f32 %v903_v12, %v903_v12  ;;  %v927_v23 = vsel %vm697_vm3, %v903_v12, 0.0 }
 0x1e3   : > { %912 = vst.msk [vmem:[%s1525_s24 + $0x30] sm:$0xff] %vm697_vm3, %v898_v16  ;;  %v925_v19 = vsel %vm697_vm3, %v898_v16, 0.0  ;;  %v943_v20 = vmul.f32 %v898_v16, %v898_v16 }
 0x1e4   : > { %v926_v22 = vadd.f32 %v925_v19, %v924_v9  ;;  %v958_v27 = vsel %vm697_vm3, %v944_v18, 0.0 }
 0x1e5   : > { %v956_v24 = vsel %vm697_vm3, %v943_v20, 0.0 }
 0x1e6   : > { %v928_v25 = vadd.f32 %v927_v23, %v926_v22  ;;  %v957_v26 = vadd.f32 %v956_v24, %v955_v13 }
 0x1e8   : > { %v929_v17 = vrot.slane %v928_v25, 4  ;;  %v959_v28 = vadd.f32 %v958_v27, %v957_v26 }
 0x1ea   : > { %v930_v21 = vadd.f32 %v929_v17, %v928_v25  ;;  %v960_v29 = vrot.slane %v959_v28, 4 }
 0x1ec   : > { %v931_v30 = vrot.slane %v930_v21, 2  ;;  %v961_v31 = vadd.f32 %v960_v29, %v959_v28 }
 0x1ee   : > { %v932_v32 = vadd.f32 %v931_v30, %v930_v21  ;;  %v962_v33 = vrot.slane %v961_v31, 2 }
 0x1f0   : > { %v933_v61 = vrot.slane %v932_v32, 1  ;;  %v963_v34 = vadd.f32 %v962_v33, %v961_v31 }
 0x1f2   : > { %v934_v35 = vadd.f32 %v933_v61, %v932_v32  ;;  %v964_v36 = vrot.slane %v963_v34, 1 }
 0x1f4   : > { %936 = vst.msk [vmem:[%s238_s27] sm:$0x1] %vm935_vm11, %v934_v35  ;;  %v965_v37 = vadd.f32 %v964_v36, %v963_v34 }
 0x1f6   : > { %966 = vst.msk [vmem:[%s241_s30] sm:$0x1] %vm935_vm11, %v965_v37 }
 0x1f7 PF: > { %s16_s18 = sadd.s32 1, %s1213_s18  }
 0x1f8   : > { %p13_p4 = scmp.ge.s32.totalorder %s16_s18, 4  }
 0x1fa   :  { %15 = sbr.rel (!%p13_p4) target bundleno = 1 (0x1), region = 119 }

// kernel: down_forward.4
= control target key start
LH: loop header
LB: loop body
LE: loop exit
PB: predicated region body
PF: predicated region fallthrough
CT: control target
= control target key end

     0   :  { %s1256_s24 = smov 0   ;;  %s1559_s0 = inlined_call_operand.vmem [shape: f32[2,8,8,8], index: 0, kind: input, shape index: {}]   ;;  %s1560_s1 = inlined_call_operand.vmem [shape: f32[1,8], index: 1, kind: input, shape index: {}]   ;;  %s1561_s2 = inlined_call_operand.vmem [shape: f32[1,8], index: 2, kind: input, shape index: {}]   ;;  %s1562_s3 = inlined_call_operand.vmem [shape: f32[72,8], index: 3, kind: input, shape index: {}]   ;;  %s1563_s4 = inlined_call_operand.vmem [shape: f32[1,8], index: 4, kind: input, shape index: {}]   ;;  %s1564_s5 = inlined_call_operand.vmem [shape: f32[2,8,8,8], index: 5, kind: output, shape index: {0}]   ;;  %s1565_s6 = inlined_call_operand.vmem [shape: f32[2,1,8], index: 6, kind: output, shape index: {1}]   ;;  %s1566_s7 = inlined_call_operand.vmem [shape: f32[2,1,8], index: 7, kind: output, shape index: {2}]  }
   0x1 LB: > { %s1085_s25 = sadd.s32 4294967295, %s1205_s24   ;;  %p1089_p0 = scmp.ge.s32.totalorder %s1205_s24, 1  ;;  %s1205_s24 = sphi %s1256_s24, %s18_s24  }
   0x2   : > { %p242_p1 = scmp.lt.s32.totalorder %s1205_s24, 3 }
   0x4   : > { %p243_p2 = pnand %p1089_p0, %p242_p1 }
   0x5   : > { %vm342_vm0 = vcmask (!%p243_p2), 64512   ;;  %vm344_vm1 = vcmask (!%p243_p2), 58368   ;;  %v1207_v0 = vmov (!%p243_p2), 0.0   ;;  %p280_p3 = scmp.lt.s32.totalorder (!%p243_p2), %s1085_s25, 1  ;;  %v1094_v1 = vld [vmem:[%s1560_s1] ss:$0 sm:$0xff] (!%p243_p2) }
   0x6   : > { %246 = sbr.rel (%p243_p2) target bundleno = 504 (0x1f8), region = 40  ;;  %343 = vst.msk [vmem:[#allocation2] sm:$0xff] (!%p243_p2), %vm342_vm0, %v1207_v0  ;;  %346 = vst.msk [vmem:[#allocation2 + $0x10] sm:$0xff] (!%p243_p2), %vm342_vm0, %v1207_v0  ;;  %v1095_v2 = vld [vmem:[%s1561_s2] ss:$0 sm:$0xff] (!%p243_p2)  ;;  %s1208_s11 = smov (!%p243_p2), 16  }
   0x7   : > { %345 = vst.msk [vmem:[#allocation2 + $0x8] sm:$0x3] (!%p243_p2), %vm344_vm1, %v1207_v0  ;;  %347 = vst.msk [vmem:[#allocation2 + $0x18] sm:$0x3] (!%p243_p2), %vm344_vm1, %v1207_v0  ;;  %s1209_s12 = smov (!%p243_p2), 8   ;;  %s1210_s13 = smov (!%p243_p2), 24  }
   0x8   : > { %348 = vst.msk [vmem:[#allocation2 + $0x20] sm:$0xff] (!%p243_p2), %vm342_vm0, %v1207_v0  ;;  %350 = vst.msk [vmem:[#allocation2 + $0x30] sm:$0xff] (!%p243_p2), %vm342_vm0, %v1207_v0  ;;  %s1211_s14 = smov (!%p243_p2), 32   ;;  %v773_v42 = vld [vmem:[%s1562_s3] sm:$0xff] (!%p243_p2)  ;;  %v774_v43 = vld [vmem:[%s1562_s3 + $0x8] sm:$0xff] (!%p243_p2)  ;;  %s1212_s19 = smov (!%p243_p2), 40  }
   0x9   : > { %349 = vst.msk [vmem:[#allocation2 + $0x28] sm:$0x3] (!%p243_p2), %vm344_vm1, %v1207_v0  ;;  %351 = vst.msk [vmem:[#allocation2 + $0x38] sm:$0x3] (!%p243_p2), %vm344_vm1, %v1207_v0  ;;  %v1156_v44 = vpack.c.bf16 (!%p243_p2), %v774_v43, %v773_v42  ;;  %v775_v47 = vld [vmem:[%s1562_s3 + $0x10] sm:$0xff] (!%p243_p2)  ;;  %v776_v48 = vld [vmem:[%s1562_s3 + $0x18] sm:$0xff] (!%p243_p2) }
   0xa   : > { %352 = vst.msk [vmem:[#allocation2 + $0x40] sm:$0xff] (!%p243_p2), %vm342_vm0, %v1207_v0  ;;  %354 = vst.msk [vmem:[#allocation2 + $0x50] sm:$0xff] (!%p243_p2), %vm342_vm0, %v1207_v0  ;;  %v1160_v49 = vpack.c.bf16 (!%p243_p2), %v776_v48, %v775_v47  ;;  %v777_v50 = vld [vmem:[%s1562_s3 + $0x20] sm:$0xff] (!%p243_p2)  ;;  %v778_v51 = vld [vmem:[%s1562_s3 + $0x28] sm:$0xff] (!%p243_p2)  ;;  %s1214_s20 = smov (!%p243_p2), 56   ;;  %s1215_s21 = smov (!%p243_p2), 64  }
   0xb   : > { %353 = vst.msk [vmem:[#allocation2 + $0x48] sm:$0x3] (!%p243_p2), %vm344_vm1, %v1207_v0  ;;  %355 = vst.msk [vmem:[#allocation2 + $0x58] sm:$0x3] (!%p243_p2), %vm344_vm1, %v1207_v0  ;;  %1157 = vmatprep.subr.bf16.mxu0 (!%p243_p2), %v1156_v44  ;;  %1172 = vmatprep.subr.bf16.mxu1 (!%p243_p2), %v1156_v44  ;;  %v1164_v52 = vpack.c.bf16 (!%p243_p2), %v778_v51, %v777_v50  ;;  %v779_v55 = vld [vmem:[%s1562_s3 + $0x30] sm:$0xff] (!%p243_p2)  ;;  %v780_v56 = vld [vmem:[%s1562_s3 + $0x38] sm:$0xff] (!%p243_p2) }
   0xc   : > { %356 = vst.msk [vmem:[#allocation2 + $0x60] sm:$0xff] (!%p243_p2), %vm342_vm0, %v1207_v0  ;;  %358 = vst.msk [vmem:[#allocation2 + $0x70] sm:$0xff] (!%p243_p2), %vm342_vm0, %v1207_v0  ;;  %1159 = vmatpush3.bf16.msra.mxu0 (!%p243_p2), %v1156_v44  ;;  %1177 = vmatpush3.bf16.msra.mxu1 (!%p243_p2), %v1156_v44  ;;  %v1168_v57 = vpack.c.bf16 (!%p243_p2), %v780_v56, %v779_v55  ;;  %v781_v58 = vld [vmem:[%s1562_s3 + $0x40] sm:$0xff] (!%p243_p2)  ;;  %vm710_vm2 = vcmask (!%p243_p2), 130048   ;;  %vm719_vm3 = vcmask (!%p243_p2), 195584   ;;  %vm728_vm4 = vcmask (!%p243_p2), 261120  }
   0xd   : > { %357 = vst.msk [vmem:[#allocation2 + $0x68] sm:$0x3] %vm344_vm1, %v1207_v0  ;;  %359 = vst.msk [vmem:[#allocation2 + $0x78] sm:$0x3] %vm344_vm1, %v1207_v0  ;;  %s1568_s25 = smov (!%p280_p3, %s1085_s25), 1  ;;  %1161 = vmatprep.subr.bf16.mxu0 %v1160_v49  ;;  %1173 = vmatprep.subr.bf16.mxu1 %v1160_v49  ;;  %vm737_vm5 = vcmask 326656  }
   0xe   : > { %360 = vst.msk [vmem:[#allocation2 + $0x80] sm:$0xff] %vm342_vm0, %v1207_v0  ;;  %362 = vst.msk [vmem:[#allocation2 + $0x90] sm:$0xff] %vm342_vm0, %v1207_v0  ;;  %s1107_s26 = sshll.u32 %s1568_s25, 6  ;;  %v389_v6 = vld [vmem:[#allocation2 + $0x2] sm:$0xff]  ;;  %vm746_vm6 = vcmask 392192   ;;  %vm755_vm7 = vcmask 457728   ;;  %s292_s23 = scalar_lea.vmem %s1565_s6, %s1568_s25 }
   0xf   : > { %361 = vst.msk [vmem:[#allocation2 + $0x88] sm:$0x3] %vm344_vm1, %v1207_v0  ;;  %363 = vst.msk [vmem:[#allocation2 + $0x98] sm:$0x3] %vm344_vm1, %v1207_v0  ;;  %s284_s8 = scalar_lea.vmem %s1559_s0, %s1107_s26  ;;  %v381_v7 = vld [vmem:[#allocation2 + $0x1] sm:$0xff]  ;;  %486 = vrot.lane.b32.xlu1 %v389_v6, %s1208_s11  ;;  %vm764_vm8 = vcmask 523264   ;;  %s295_s29 = scalar_lea.vmem %s1566_s7, %s1568_s25 }
  0x10   : > { %v298_v3 = vld [vmem:[%s284_s8] sm:$0xff]  ;;  %v299_v4 = vld [vmem:[%s284_s8 + $0x8] sm:$0xff]  ;;  %v300_v5 = vld [vmem:[%s284_s8 + $0x10] sm:$0xff]  ;;  %454 = vrot.lane.b32.xlu0 %v381_v7, %s1209_s12  ;;  %1163 = vmatpush3.bf16.msra.mxu0 %v1160_v49  ;;  %vm789_vm9 = vcmask 588800   ;;  %vm948_vm10 = vcmask 57344  }
  0x11   : > { %v312_v8 = vmul.f32 %v1094_v1, %v298_v3  ;;  %v313_v9 = vmul.f32 %v1094_v1, %v299_v4  ;;  %v314_v10 = vmul.f32 %v1094_v1, %v300_v5  ;;  %v301_v11 = vld [vmem:[%s284_s8 + $0x18] sm:$0xff]  ;;  %v302_v13 = vld [vmem:[%s284_s8 + $0x20] sm:$0xff]  ;;  %v303_v14 = vld [vmem:[%s284_s8 + $0x28] sm:$0xff]  ;;  %1178 = vmatpush3.bf16.msra.mxu1 %v1160_v49  ;;  %1165 = vmatprep.subr.bf16.mxu0 %v1164_v52 }
  0x12   : > { %v315_v12 = vmul.f32 %v1094_v1, %v301_v11  ;;  %v316_v18 = vmul.f32 %v1094_v1, %v302_v13  ;;  %v304_v19 = vld [vmem:[%s284_s8 + $0x30] sm:$0xff]  ;;  %v305_v20 = vld [vmem:[%s284_s8 + $0x38] sm:$0xff]  ;;  %v317_v22 = vmul.f32 %v1094_v1, %v303_v14  ;;  %s1213_s8 = smov 48   ;;  %1174 = vmatprep.subr.bf16.mxu1 %v1164_v52 }
  0x13   : > { %v326_v15 = vadd.f32 %v1095_v2, %v312_v8  ;;  %v327_v16 = vadd.f32 %v1095_v2, %v313_v9  ;;  %v328_v17 = vadd.f32 %v1095_v2, %v314_v10  ;;  %v318_v23 = vmul.f32 %v1094_v1, %v304_v19 }
  0x14   : > { %v329_v21 = vadd.f32 %v1095_v2, %v315_v12  ;;  %v319_v24 = vmul.f32 %v1094_v1, %v305_v20  ;;  %v330_v28 = vadd.f32 %v1095_v2, %v316_v18  ;;  %v331_v30 = vadd.f32 %v1095_v2, %v317_v22  ;;  %1167 = vmatpush3.bf16.msra.mxu0 %v1164_v52 }
  0x15   : > { %v334_v25 = vmax.f32 %v326_v15, 0.0  ;;  %v335_v26 = vmax.f32 %v327_v16, 0.0  ;;  %v336_v27 = vmax.f32 %v328_v17, 0.0  ;;  %v332_v31 = vadd.f32 %v1095_v2, %v318_v23  ;;  %1179 = vmatpush3.bf16.msra.mxu1 %v1164_v52  ;;  %1169 = vmatprep.subr.bf16.mxu0 %v1168_v57  ;;  %v429_v12 = vld [vmem:[#allocation2 + $0x90] sm:$0xff] }
  0x16   : > { %v337_v29 = vmax.f32 %v329_v21, 0.0  ;;  %v333_v32 = vadd.f32 %v1095_v2, %v319_v24  ;;  %v338_v33 = vmax.f32 %v330_v28, 0.0  ;;  %v339_v34 = vmax.f32 %v331_v30, 0.0  ;;  %1175 = vmatprep.subr.bf16.mxu1 %v1168_v57  ;;  %v437_v13 = vld [vmem:[#allocation2 + $0x91] sm:$0xff] }
  0x17   : > { %365 = vst.msk [vmem:[#allocation2 + $0x11] sm:$0xff] %vm342_vm0, %v334_v25  ;;  %366 = vst.msk [vmem:[#allocation2 + $0x21] sm:$0xff] %vm342_vm0, %v335_v26  ;;  %v340_v35 = vmax.f32 %v332_v31, 0.0  ;;  %v445_v16 = vld [vmem:[#allocation2 + $0x92] sm:$0xff] }
  0x18   : > { %367 = vst.msk [vmem:[#allocation2 + $0x31] sm:$0xff] %vm342_vm0, %v336_v27  ;;  %368 = vst.msk [vmem:[#allocation2 + $0x41] sm:$0xff] %vm342_vm0, %v337_v29  ;;  %v341_v36 = vmax.f32 %v333_v32, 0.0  ;;  %1171 = vmatpush3.bf16.msra.mxu0 %v1168_v57  ;;  %v373_v29 = vld [vmem:[#allocation2] sm:$0xff] }
  0x19   : > { %369 = vst.msk [vmem:[#allocation2 + $0x51] sm:$0xff] %vm342_vm0, %v338_v33  ;;  %370 = vst.msk [vmem:[#allocation2 + $0x61] sm:$0xff] %vm342_vm0, %v339_v34  ;;  %1180 = vmatpush3.bf16.msra.mxu1 %v1168_v57  ;;  %1142 = vmatprep.subr.mxu0 %v781_v58 }
  0x1a   : > { %371 = vst.msk [vmem:[#allocation2 + $0x71] sm:$0xff] %vm342_vm0, %v340_v35  ;;  %372 = vst.msk [vmem:[#allocation2 + $0x81] sm:$0xff] %vm342_vm0, %v341_v36  ;;  %1176 = vmatprep.subr.mxu1 %v781_v58 }
  0x1c   : > { %1143 = vmatpush3.msra.mxu0 %v781_v58 }
  0x1d   : > { %1181 = vmatpush3.msra.mxu1 %v781_v58 }
  0x1e   : > { %v390_v37 = vld [vmem:[#allocation2 + $0x12] sm:$0xff]  ;;  %v1310_v39 = vld [vmem:[#allocation2 + $0x20] sm:$0xff] }
  0x1f   : > { %v382_v38 = vld [vmem:[#allocation2 + $0x11] sm:$0xff]  ;;  %488 = vrot.lane.b32.xlu1 %v390_v37, %s1208_s11  ;;  %v383_v41 = vld [vmem:[#allocation2 + $0x21] sm:$0xff] }
  0x20   : > { %456 = vrot.lane.b32.xlu0 %v382_v38, %s1209_s12  ;;  %v1312_v40 = vld [vmem:[#allocation2 + $0x10] sm:$0xff]  ;;  %v391_v45 = vld [vmem:[#allocation2 + $0x22] sm:$0xff] }
  0x21   : > { %v384_v46 = vld [vmem:[#allocation2 + $0x31] sm:$0xff]  ;;  %v1362_v59 = vld [vmem:[#allocation2 + $0x40] sm:$0xff] }
  0x22   : > { %v1345_v53 = vld [vmem:[#allocation2 + $0x30] sm:$0xff]  ;;  %v408_v60 = vld [vmem:[#allocation2 + $0x41] sm:$0xff] }
  0x23   : > { %520 = vrot.lane.b32.xlu1 %v1310_v39, %s1210_s13  ;;  %v392_v54 = vld [vmem:[#allocation2 + $0x32] sm:$0xff]  ;;  %v393_v61 = vld [vmem:[#allocation2 + $0x42] sm:$0xff] }
  0x24   : > { %518 = vrot.lane.b32.xlu0 %v1312_v40, %s1210_s13  ;;  %v386_v62 = vld [vmem:[#allocation2 + $0x51] sm:$0xff]  ;;  %v1386_v1 = vld [vmem:[#allocation2 + $0x60] sm:$0xff] }
  0x25   : > { %v1378_v63 = vld [vmem:[#allocation2 + $0x50] sm:$0xff]  ;;  %v410_v2 = vld [vmem:[#allocation2 + $0x61] sm:$0xff] }
  0x26   : > { %v394_v0 = vld [vmem:[#allocation2 + $0x52] sm:$0xff]  ;;  %v395_v3 = vld [vmem:[#allocation2 + $0x62] sm:$0xff] }
  0x27   : > { %458 = vrot.lane.b32.xlu1 %v383_v41, %s1209_s12  ;;  %v388_v4 = vld [vmem:[#allocation2 + $0x71] sm:$0xff]  ;;  %v404_v7 = vld [vmem:[#allocation2 + $0x80] sm:$0xff] }
  0x28   : > { %550 = vrot.lane.b32.xlu0 %v382_v38, %s1211_s14  ;;  %v1402_v5 = vld [vmem:[#allocation2 + $0x70] sm:$0xff]  ;;  %v412_v8 = vld [vmem:[#allocation2 + $0x81] sm:$0xff] }
  0x29   : > { %v396_v6 = vld [vmem:[#allocation2 + $0x72] sm:$0xff]  ;;  %v420_v9 = vld [vmem:[#allocation2 + $0x82] sm:$0xff] }
  0x2b   : > { %582 = vrot.lane.b32.xlu1 %v390_v37, %s1212_s19 }
  0x2c   : > { %552 = vrot.lane.b32.xlu0 %v383_v41, %s1211_s14 }
  0x2f   : > { %490 = vrot.lane.b32.xlu1 %v391_v45, %s1208_s11 }
  0x30   : > { %460 = vrot.lane.b32.xlu0 %v384_v46, %s1209_s12 }
  0x33   : > { %614 = vrot.lane.b32.xlu1 %v1310_v39, %s1213_s8 }
  0x34   : > { %584 = vrot.lane.b32.xlu0 %v391_v45, %s1212_s19 }
  0x37   : > { %522 = vrot.lane.b32.xlu1 %v1345_v53, %s1210_s13 }
  0x38   : > { %492 = vrot.lane.b32.xlu0 %v392_v54, %s1208_s11 }
  0x3b   : > { %646 = vrot.lane.b32.xlu1 %v383_v41, %s1214_s20 }
  0x3c   : > { %616 = vrot.lane.b32.xlu0 %v1345_v53, %s1213_s8 }
  0x3f   : > { %554 = vrot.lane.b32.xlu1 %v384_v46, %s1211_s14 }
  0x40   : > { %524 = vrot.lane.b32.xlu0 %v1362_v59, %s1210_s13 }
  0x43   : > { %678 = vrot.lane.b32.xlu1 %v391_v45, %s1215_s21 }
  0x44   : > { %648 = vrot.lane.b32.xlu0 %v384_v46, %s1214_s20 }
  0x47   : > { %556 = vrot.lane.b32.xlu1 %v408_v60, %s1211_s14 }
  0x48   : > { %462 = vrot.lane.b32.xlu0 %v408_v60, %s1209_s12 }
  0x4b   : > { %680 = vrot.lane.b32.xlu1 %v392_v54, %s1215_s21 }
  0x4c   : > { %586 = vrot.lane.b32.xlu0 %v392_v54, %s1212_s19 }
  0x4f   : > { %494 = vrot.lane.b32.xlu1 %v393_v61, %s1208_s11 }
  0x50   : > { %464 = vrot.lane.b32.xlu0 %v386_v62, %s1209_s12 }
  0x53   : > { %618 = vrot.lane.b32.xlu1 %v1362_v59, %s1213_s8 }
  0x54   : > { %588 = vrot.lane.b32.xlu0 %v393_v61, %s1212_s19 }
  0x57   : > { %526 = vrot.lane.b32.xlu1 %v1378_v63, %s1210_s13 }
  0x58   : > { %496 = vrot.lane.b32.xlu0 %v394_v0, %s1208_s11 }
  0x5b   : > { %650 = vrot.lane.b32.xlu1 %v408_v60, %s1214_s20 }
  0x5c   : > { %620 = vrot.lane.b32.xlu0 %v1378_v63, %s1213_s8 }
  0x5f   : > { %558 = vrot.lane.b32.xlu1 %v386_v62, %s1211_s14 }
  0x60   : > { %528 = vrot.lane.b32.xlu0 %v1386_v1, %s1210_s13 }
  0x63   : > { %682 = vrot.lane.b32.xlu1 %v393_v61, %s1215_s21 }
  0x64   : > { %652 = vrot.lane.b32.xlu0 %v386_v62, %s1214_s20 }
  0x67   : > { %560 = vrot.lane.b32.xlu1 %v410_v2, %s1211_s14 }
  0x68   : > { %466 = vrot.lane.b32.xlu0 %v410_v2, %s1209_s12 }
  0x6b   : > { %684 = vrot.lane.b32.xlu1 %v394_v0, %s1215_s21 }
  0x6c   : > { %590 = vrot.lane.b32.xlu0 %v394_v0, %s1212_s19 }
  0x6f   : > { %498 = vrot.lane.b32.xlu1 %v395_v3, %s1208_s11 }
  0x70   : > { %468 = vrot.lane.b32.xlu0 %v388_v4, %s1209_s12 }
  0x73   : > { %622 = vrot.lane.b32.xlu1 %v1386_v1, %s1213_s8 }
  0x74   : > { %592 = vrot.lane.b32.xlu0 %v395_v3, %s1212_s19 }
  0x77   : > { %530 = vrot.lane.b32.xlu1 %v1402_v5, %s1210_s13 }
  0x78   : > { %500 = vrot.lane.b32.xlu0 %v396_v6, %s1208_s11 }
  0x7b   : > { %654 = vrot.lane.b32.xlu1 %v410_v2, %s1214_s20 }
  0x7c   : > { %624 = vrot.lane.b32.xlu0 %v1402_v5, %s1213_s8 }
  0x7f   : > { %562 = vrot.lane.b32.xlu1 %v388_v4, %s1211_s14 }
  0x80   : > { %532 = vrot.lane.b32.xlu0 %v404_v7, %s1210_s13 }
  0x81   : > { %v487_v10 = vpop.permute.xlu1 %486 }
  0x82   : > { %v455_v11 = vpop.permute.xlu0 %454 }
  0x83   : > { %686 = vrot.lane.b32.xlu1 %v395_v3, %s1215_s21  ;;  %v702_v30 = vsel %vm342_vm0, %v373_v29, %v455_v11 }
  0x84   : > { %656 = vrot.lane.b32.xlu0 %v388_v4, %s1214_s20  ;;  %v711_v33 = vsel %vm710_vm2, %v702_v30, %v487_v10 }
  0x87   : > { %594 = vrot.lane.b32.xlu1 %v396_v6, %s1212_s19 }
  0x88   : > { %564 = vrot.lane.b32.xlu0 %v412_v8, %s1211_s14 }
  0x8b   : > { %596 = vrot.lane.b32.xlu1 %v420_v9, %s1212_s19  ;;  %s1514_s19 = scalar_lea.vmem %s1564_s5, %s1107_s26 }
  0x8c   : > { %688 = vrot.lane.b32.xlu0 %v396_v6, %s1215_s21 }
  0x8f   : > { %628 = vrot.lane.b32.xlu1 %v429_v12, %s1213_s8 }
  0x90   : > { %626 = vrot.lane.b32.xlu0 %v404_v7, %s1213_s8 }
  0x91   : > { %v489_v14 = vpop.permute.xlu1 %488 }
  0x92   : > { %v457_v15 = vpop.permute.xlu0 %456 }
  0x93   : > { %660 = vrot.lane.b32.xlu1 %v437_v13, %s1214_s20  ;;  %v703_v42 = vsel %vm342_vm0, %v1312_v40, %v457_v15 }
  0x94   : > { %658 = vrot.lane.b32.xlu0 %v412_v8, %s1214_s20  ;;  %v712_v47 = vsel %vm710_vm2, %v703_v42, %v489_v14 }
  0x95   : > { %v521_v17 = vpop.permute.xlu1 %520 }
  0x96   : > { %v519_v18 = vpop.permute.xlu0 %518  ;;  %v721_v48 = vsel %vm719_vm3, %v712_v47, %v521_v17 }
  0x97   : > { %692 = vrot.lane.b32.xlu1 %v445_v16, %s1215_s21  ;;  %v720_v34 = vsel %vm719_vm3, %v711_v33, %v519_v18 }
  0x98   : > { %690 = vrot.lane.b32.xlu0 %v420_v9, %s1215_s21 }
  0x99   : > { %v459_v19 = vpop.permute.xlu1 %458 }
  0x9a   : > { %v551_v20 = vpop.permute.xlu0 %550  ;;  %v704_v6 = vsel %vm342_vm0, %v1310_v39, %v459_v19 }
  0x9b   : > { %v729_v37 = vsel %vm728_vm4, %v720_v34, %v551_v20 }
  0x9d   : > { %v583_v21 = vpop.permute.xlu1 %582 }
  0x9e   : > { %v553_v22 = vpop.permute.xlu0 %552  ;;  %v738_v38 = vsel %vm737_vm5, %v729_v37, %v583_v21 }
  0x9f   : > { %v730_v51 = vsel %vm728_vm4, %v721_v48, %v553_v22 }
  0xa1   : > { %v491_v23 = vpop.permute.xlu1 %490 }
  0xa2   : > { %v1424_v24 = vpop.permute.xlu0 %460  ;;  %v713_v7 = vsel %vm710_vm2, %v704_v6, %v491_v23 }
  0xa3   : > { %v705_v39 = vsel %vm342_vm0, %v1345_v53, %v1424_v24 }
  0xa5   : > { %v615_v25 = vpop.permute.xlu1 %614 }
  0xa6   : > { %v585_v26 = vpop.permute.xlu0 %584  ;;  %v747_v41 = vsel %vm746_vm6, %v738_v38, %v615_v25 }
  0xa7   : > { %v739_v52 = vsel %vm737_vm5, %v730_v51, %v585_v26 }
  0xa9   : > { %v523_v27 = vpop.permute.xlu1 %522 }
  0xaa   : > { %v493_v28 = vpop.permute.xlu0 %492  ;;  %v722_v8 = vsel %vm719_vm3, %v713_v7, %v523_v27 }
  0xab   : > { %v714_v18 = vsel %vm710_vm2, %v705_v39, %v493_v28 }
  0xad   : > { %v647_v31 = vpop.permute.xlu1 %646 }
  0xae   : > { %v617_v32 = vpop.permute.xlu0 %616  ;;  %v756_v43 = vsel %vm755_vm7, %v747_v41, %v647_v31 }
  0xaf   : > { %v748_v40 = vsel %vm746_vm6, %v739_v52, %v617_v32 }
  0xb1   : > { %v555_v35 = vpop.permute.xlu1 %554 }
  0xb2   : > { %v525_v36 = vpop.permute.xlu0 %524  ;;  %v731_v11 = vsel %vm728_vm4, %v722_v8, %v555_v35 }
  0xb3   : > { %v723_v19 = vsel %vm719_vm3, %v714_v18, %v525_v36 }
  0xb5   : > { %v679_v44 = vpop.permute.xlu1 %678 }
  0xb6   : > { %v649_v45 = vpop.permute.xlu0 %648  ;;  %v765_v46 = vsel %vm764_vm8, %v756_v43, %v679_v44 }
  0xb7   : > { %1144 = vmatprep.mubr.msk.f32.mxu0 %vm789_vm9, %v765_v46  ;;  %v757_v54 = vsel %vm755_vm7, %v748_v40, %v649_v45 }
  0xb9   : > { %v557_v49 = vpop.permute.xlu1 %556 }
  0xba   : > { %v463_v50 = vpop.permute.xlu0 %462  ;;  %v732_v22 = vsel %vm728_vm4, %v723_v19, %v557_v49  ;;  %v1096_v19 = vld [vmem:[%s1563_s4] ss:$0 sm:$0xff] }
  0xbb   : > { %v706_v36 = vsel %vm342_vm0, %v1362_v59, %v463_v50 }
  0xbd   : > { %v681_v55 = vpop.permute.xlu1 %680 }
  0xbe   : > { %v587_v56 = vpop.permute.xlu0 %586  ;;  %v766_v57 = vsel %vm764_vm8, %v757_v54, %v681_v55 }
  0xbf   : > { %1145 = vmatmul.mubr.msk.f32.vlgmr.msra.gmra.mrb[0].mxu0 %vm789_vm9, %v766_v57  ;;  %v740_v12 = vsel %vm737_vm5, %v731_v11, %v587_v56 }
  0xc1   : > { %v495_v58 = vpop.permute.xlu1 %494 }
  0xc2   : > { %v465_v60 = vpop.permute.xlu0 %464  ;;  %v715_v37 = vsel %vm710_vm2, %v706_v36, %v495_v58 }
  0xc3   : > { %v707_v59 = vsel %vm342_vm0, %v1378_v63, %v465_v60 }
  0xc5   : > { %v619_v61 = vpop.permute.xlu1 %618 }
  0xc6   : > { %v589_v62 = vpop.permute.xlu0 %588  ;;  %v749_v13 = vsel %vm746_vm6, %v740_v12, %v619_v61 }
  0xc7   : > { %v741_v23 = vsel %vm737_vm5, %v732_v22, %v589_v62 }
  0xc9   : > { %v527_v0 = vpop.permute.xlu1 %526 }
  0xca   : > { %v497_v2 = vpop.permute.xlu0 %496  ;;  %v724_v38 = vsel %vm719_vm3, %v715_v37, %v527_v0 }
  0xcb   : > { %v716_v50 = vsel %vm710_vm2, %v707_v59, %v497_v2 }
  0xcd   : > { %v651_v3 = vpop.permute.xlu1 %650 }
  0xce   : > { %v621_v4 = vpop.permute.xlu0 %620  ;;  %v758_v14 = vsel %vm755_vm7, %v749_v13, %v651_v3 }
  0xcf   : > { %v750_v25 = vsel %vm746_vm6, %v741_v23, %v621_v4 }
  0xd1   : > { %v559_v9 = vpop.permute.xlu1 %558 }
  0xd2   : > { %v529_v10 = vpop.permute.xlu0 %528  ;;  %v733_v43 = vsel %vm728_vm4, %v724_v38, %v559_v9 }
  0xd3   : > { %v725_v51 = vsel %vm719_vm3, %v716_v50, %v529_v10 }
  0xd5   : > { %v683_v15 = vpop.permute.xlu1 %682 }
  0xd6   : > { %v653_v16 = vpop.permute.xlu0 %652  ;;  %v767_v17 = vsel %vm764_vm8, %v758_v14, %v683_v15 }
  0xd7   : > { %1147 = vmatprep.mubr.msk.f32.mxu0 %vm789_vm9, %v767_v17  ;;  %v759_v26 = vsel %vm755_vm7, %v750_v25, %v653_v16 }
  0xd9   : > { %v561_v20 = vpop.permute.xlu1 %560 }
  0xda   : > { %v467_v21 = vpop.permute.xlu0 %466  ;;  %v734_v54 = vsel %vm728_vm4, %v725_v51, %v561_v20 }
  0xdb   : > { %v708_v0 = vsel %vm342_vm0, %v1386_v1, %v467_v21 }
  0xdd   : > { %v685_v27 = vpop.permute.xlu1 %684 }
  0xde   : > { %v591_v29 = vpop.permute.xlu0 %590  ;;  %v768_v53 = vsel %vm764_vm8, %v759_v26, %v685_v27 }
  0xdf   : > { %1148 = vmatmul.mubr.msk.f32.gmra.mrb[2].mxu0 %vm789_vm9, %v768_v53  ;;  %v742_v44 = vsel %vm737_vm5, %v733_v43, %v591_v29 }
  0xe1   : > { %v499_v24 = vpop.permute.xlu1 %498 }
  0xe2   : > { %v469_v28 = vpop.permute.xlu0 %468  ;;  %v717_v3 = vsel %vm710_vm2, %v708_v0, %v499_v24 }
  0xe3   : > { %v709_v2 = vsel %vm342_vm0, %v1402_v5, %v469_v28 }
  0xe5   : > { %v623_v30 = vpop.permute.xlu1 %622 }
  0xe6   : > { %v593_v31 = vpop.permute.xlu0 %592  ;;  %v751_v45 = vsel %vm746_vm6, %v742_v44, %v623_v30 }
  0xe7   : > { %v743_v55 = vsel %vm737_vm5, %v734_v54, %v593_v31 }
  0xe9   : > { %v531_v32 = vpop.permute.xlu1 %530 }
  0xea   : > { %v501_v33 = vpop.permute.xlu0 %500  ;;  %v726_v6 = vsel %vm719_vm3, %v717_v3, %v531_v32 }
  0xeb   : > { %v718_v4 = vsel %vm710_vm2, %v709_v2, %v501_v33 }
  0xed   : > { %v655_v34 = vpop.permute.xlu1 %654 }
  0xee   : > { %v625_v35 = vpop.permute.xlu0 %624  ;;  %v760_v46 = vsel %vm755_vm7, %v751_v45, %v655_v34 }
  0xef   : > { %v752_v56 = vsel %vm746_vm6, %v743_v55, %v625_v35 }
  0xf1   : > { %v563_v41 = vpop.permute.xlu1 %562 }
  0xf2   : > { %v533_v42 = vpop.permute.xlu0 %532  ;;  %v735_v10 = vsel %vm728_vm4, %v726_v6, %v563_v41 }
  0xf3   : > { %v727_v7 = vsel %vm719_vm3, %v718_v4, %v533_v42 }
  0xf5   : > { %v687_v47 = vpop.permute.xlu1 %686 }
  0xf6   : > { %v657_v48 = vpop.permute.xlu0 %656  ;;  %v769_v49 = vsel %vm764_vm8, %v760_v46, %v687_v47 }
  0xf7   : > { %1150 = vmatprep.mubr.msk.f32.mxu1 %vm789_vm9, %v769_v49  ;;  %v761_v57 = vsel %vm755_vm7, %v752_v56, %v657_v48 }
  0xf9   : > { %v595_v52 = vpop.permute.xlu1 %594 }
  0xfa   : > { %v565_v40 = vpop.permute.xlu0 %564  ;;  %v744_v1 = vsel %vm737_vm5, %v735_v10, %v595_v52 }
  0xfb   : > { %v736_v11 = vsel %vm728_vm4, %v727_v7, %v565_v40 }
  0xfd   : > { %v597_v58 = vpop.permute.xlu1 %596 }
  0xfe   : > { %v689_v61 = vpop.permute.xlu0 %688  ;;  %v745_v12 = vsel %vm737_vm5, %v736_v11, %v597_v58 }
  0xff   : > { %v770_v63 = vsel %vm764_vm8, %v761_v57, %v689_v61 }
 0x100   : > { %1151 = vmatmul.mubr.msk.f32.vlgmr.msra.gmra.mrb[0].mxu1 %vm789_vm9, %v770_v63 }
 0x101   : > { %v629_v60 = vpop.permute.xlu1 %628 }
 0x102   : > { %v627_v62 = vpop.permute.xlu0 %626  ;;  %v754_v5 = vsel %vm746_vm6, %v745_v12, %v629_v60 }
 0x103   : > { %v753_v13 = vsel %vm746_vm6, %v744_v1, %v627_v62 }
 0x105   : > { %v661_v8 = vpop.permute.xlu1 %660 }
 0x106   : > { %v659_v9 = vpop.permute.xlu0 %658  ;;  %v763_v14 = vsel %vm755_vm7, %v754_v5, %v661_v8 }
 0x107   : > { %v762_v15 = vsel %vm755_vm7, %v753_v13, %v659_v9 }
 0x109   : > { %v693_v16 = vpop.permute.xlu1 %692 }
 0x10a   : > { %v691_v17 = vpop.permute.xlu0 %690  ;;  %v772_v39 = vsel %vm764_vm8, %v763_v14, %v693_v16 }
 0x10b   : > { %v771_v18 = vsel %vm764_vm8, %v762_v15, %v691_v17 }
 0x10c   : > { %1153 = vmatprep.mubr.msk.f32.mxu1 %vm789_vm9, %v771_v18 }
 0x10d   : > { %1154 = vmatmul.mubr.msk.f32.gmra.mrb[2].mxu1 %vm789_vm9, %v772_v39 }
 0x192   : > { %v1146_v20 = vpop.f32.mrb[0].mxu0 }
 0x193   : > { %v886_v21 = vadd.f32 %v1146_v20, %v1096_v19  ;;  %v880_v22 = vpop.f32.mrb[1].mxu0 }
 0x194   : > { %v881_v23 = vadd.f32 %v1096_v19, %v880_v22 }
 0x195   : > { %920 = vst.msk [vmem:[%s1514_s19 + $0x8] sm:$0xff] %vm342_vm0, %v886_v21  ;;  %v928_v25 = vsel %vm342_vm0, %v886_v21, 0.0  ;;  %v951_v26 = vmul.f32 %v886_v21, %v886_v21 }
 0x196   : > { %919 = vst.msk [vmem:[%s1514_s19] sm:$0xff] %vm342_vm0, %v881_v23  ;;  %v927_v27 = vsel %vm342_vm0, %v881_v23, 0.0  ;;  %v950_v29 = vmul.f32 %v881_v23, %v881_v23 }
 0x197   : > { %v959_v53 = vsel %vm342_vm0, %v951_v26, 0.0  ;;  %v929_v24 = vadd.f32 %v928_v25, %v927_v27 }
 0x198   : > { %v958_v28 = vsel %vm342_vm0, %v950_v29, 0.0 }
 0x199   : > { %v960_v30 = vadd.f32 %v959_v53, %v958_v28 }
 0x1b2   : > { %v1149_v31 = vpop.f32.mrb[2].mxu0 }
 0x1b3   : > { %v896_v32 = vadd.f32 %v1149_v31, %v1096_v19  ;;  %v890_v33 = vpop.f32.mrb[3].mxu0 }
 0x1b4   : > { %v891_v34 = vadd.f32 %v1096_v19, %v890_v33 }
 0x1b5   : > { %922 = vst.msk [vmem:[%s1514_s19 + $0x18] sm:$0xff] %vm342_vm0, %v896_v32  ;;  %v953_v35 = vmul.f32 %v896_v32, %v896_v32  ;;  %v932_v41 = vsel %vm342_vm0, %v896_v32, 0.0 }
 0x1b6   : > { %921 = vst.msk [vmem:[%s1514_s19 + $0x10] sm:$0xff] %vm342_vm0, %v891_v34  ;;  %v930_v36 = vsel %vm342_vm0, %v891_v34, 0.0  ;;  %v952_v37 = vmul.f32 %v891_v34, %v891_v34 }
 0x1b7   : > { %v931_v38 = vadd.f32 %v930_v36, %v929_v24  ;;  %v963_v45 = vsel %vm342_vm0, %v953_v35, 0.0 }
 0x1b8   : > { %v961_v42 = vsel %vm342_vm0, %v952_v37, 0.0 }
 0x1b9   : > { %v962_v43 = vadd.f32 %v961_v42, %v960_v30  ;;  %v933_v44 = vadd.f32 %v932_v41, %v931_v38 }
 0x1bb   : > { %v964_v46 = vadd.f32 %v963_v45, %v962_v43 }
 0x1d3   : > { %v1152_v47 = vpop.f32.mrb[0].mxu1 }
 0x1d4   : > { %v906_v48 = vadd.f32 %v1152_v47, %v1096_v19  ;;  %v900_v49 = vpop.f32.mrb[1].mxu1 }
 0x1d5   : > { %v901_v59 = vadd.f32 %v1096_v19, %v900_v49 }
 0x1d6   : > { %924 = vst.msk [vmem:[%s1514_s19 + $0x28] sm:$0xff] %vm342_vm0, %v906_v48  ;;  %v955_v50 = vmul.f32 %v906_v48, %v906_v48  ;;  %v936_v54 = vsel %vm342_vm0, %v906_v48, 0.0 }
 0x1d7   : > { %923 = vst.msk [vmem:[%s1514_s19 + $0x20] sm:$0xff] %vm342_vm0, %v901_v59  ;;  %v934_v51 = vsel %vm342_vm0, %v901_v59, 0.0  ;;  %v954_v52 = vmul.f32 %v901_v59, %v901_v59 }
 0x1d8   : > { %v935_v40 = vadd.f32 %v934_v51, %v933_v44  ;;  %v967_v58 = vsel %vm342_vm0, %v955_v50, 0.0 }
 0x1d9   : > { %v965_v55 = vsel %vm342_vm0, %v954_v52, 0.0 }
 0x1da   : > { %v966_v56 = vadd.f32 %v965_v55, %v964_v46  ;;  %v937_v57 = vadd.f32 %v936_v54, %v935_v40 }
 0x1dc   : > { %v968_v61 = vadd.f32 %v967_v58, %v966_v56 }
 0x1e0   : > { %v1155_v63 = vpop.f32.mrb[2].mxu1 }
 0x1e1   : > { %v916_v60 = vadd.f32 %v1155_v63, %v1096_v19  ;;  %v910_v62 = vpop.f32.mrb[3].mxu1 }
 0x1e2   : > { %v911_v0 = vadd.f32 %v1096_v19, %v910_v62 }
 0x1e3   : > { %926 = vst.msk [vmem:[%s1514_s19 + $0x38] sm:$0xff] %vm342_vm0, %v916_v60  ;;  %v957_v2 = vmul.f32 %v916_v60, %v916_v60  ;;  %v940_v7 = vsel %vm342_vm0, %v916_v60, 0.0 }
 0x1e4   : > { %925 = vst.msk [vmem:[%s1514_s19 + $0x30] sm:$0xff] %vm342_vm0, %v911_v0  ;;  %v938_v3 = vsel %vm342_vm0, %v911_v0, 0.0  ;;  %v956_v4 = vmul.f32 %v911_v0, %v911_v0 }
 0x1e5   : > { %v939_v6 = vadd.f32 %v938_v3, %v937_v57  ;;  %v971_v11 = vsel %vm342_vm0, %v957_v2, 0.0 }
 0x1e6   : > { %v969_v8 = vsel %vm342_vm0, %v956_v4, 0.0 }
 0x1e7   : > { %v941_v9 = vadd.f32 %v940_v7, %v939_v6  ;;  %v970_v10 = vadd.f32 %v969_v8, %v968_v61 }
 0x1e9   : > { %v942_v1 = vrot.slane %v941_v9, 4  ;;  %v972_v12 = vadd.f32 %v971_v11, %v970_v10 }
 0x1eb   : > { %v943_v5 = vadd.f32 %v942_v1, %v941_v9  ;;  %v973_v13 = vrot.slane %v972_v12, 4 }
 0x1ed   : > { %v944_v14 = vrot.slane %v943_v5, 2  ;;  %v974_v15 = vadd.f32 %v973_v13, %v972_v12 }
 0x1ef   : > { %v945_v16 = vadd.f32 %v944_v14, %v943_v5  ;;  %v975_v17 = vrot.slane %v974_v15, 2 }
 0x1f1   : > { %v946_v39 = vrot.slane %v945_v16, 1  ;;  %v976_v18 = vadd.f32 %v975_v17, %v974_v15 }
 0x1f3   : > { %v947_v19 = vadd.f32 %v946_v39, %v945_v16  ;;  %v977_v20 = vrot.slane %v976_v18, 1 }
 0x1f5   : > { %949 = vst.msk [vmem:[%s292_s23] sm:$0x1] %vm948_vm10, %v947_v19  ;;  %v978_v21 = vadd.f32 %v977_v20, %v976_v18 }
 0x1f7   : > { %979 = vst.msk [vmem:[%s295_s29] sm:$0x1] %vm948_vm10, %v978_v21 }
 0x1f8 PF: > { %s18_s24 = sadd.s32 1, %s1205_s24  }
 0x1f9   : > { %p15_p4 = scmp.ge.s32.totalorder %s18_s24, 4  }
 0x1fb   :  { %17 = sbr.rel (!%p15_p4) target bundleno = 1 (0x1), region = 96 }

</bundles_post_ra>
